<compile_context>
chip_gen: v7x
topology: tpu7x:2x2x1
jax: 0.10.0
libtpu: 0.0.40
codegen_flags: <defaults>
</compile_context>

<pallas_src>
import jax
import jax.numpy as jnp
from jax import lax
from jax.experimental import pallas as pl
from jax.experimental.pallas import tpu as pltpu

# ------------------------- configuration (small) ----------------------------
B = 2                          # batch
C_IN = 3                       # input image channels
H_IN = W_IN = 8                # input spatial size
K, STRIDE, PAD = 3, 2, 1
OH = OW = (H_IN + 2 * PAD - K) // STRIDE + 1      # 4
G = OH * OW                    # 16 grid cells       (stands in for 7*7)
C_FEAT = 128                   # conv channels       (stands in for 512)
FLAT_DIM = C_FEAT * G          # 2048                (stands in for 512*7*7)
E = 64                         # verb / role embedding & attention dim
HID = 128                      # per-role hidden-rep dim
MAX_ROLES = 6                  # encoder.max_role_count
N_VERBS = 10
N_LABELS = 32                  # classifier output dim
IMG_EMB = 128                  # flatten_img / reconstruct_img output dim
KDIM = K * K * C_IN            # 27
KPAD = 32                      # patch columns padded for aligned MXU LHS
CLS_PAD = 128                  # lane-dense classifier slab (sliced to N_LABELS)
DTYPE = jnp.float32
WDTYPE = jnp.bfloat16          # storage dtype of matmul weights


# ----------------------------- fused Pallas kernel --------------------------
def _fused_forward_kernel(
        # inputs
        patches_ref,            # (B*G, KPAD)          f32  im2col patches, b-major rows
        q_base_ref,             # (B, E)               f32  gathered verb-embedding rows
        conv_w_ref,             # (KPAD, C_FEAT)       bf16
        conv_b_ref,             # (1, C_FEAT)          f32
        flat_w_ref,             # (G*C_FEAT, IMG_EMB)  bf16 (NCHW flatten folded in)
        flat_b_ref,             # (1, IMG_EMB)         f32
        kproj_w_ref,            # (C_FEAT, E)          bf16
        kproj_b_ref,            # (1, E)               f32
        role_emb_ref,           # (MAX_ROLES, E)       f32
        hid_w_ref,              # (E, HID)             bf16
        hid_b_ref,              # (1, HID)             f32
        rec_w_ref,              # (MAX_ROLES*HID, IMG_EMB) bf16
        rec_b_ref,              # (1, IMG_EMB)         f32
        cls_w_ref,              # (HID, CLS_PAD)       bf16 (zero-padded past N_LABELS)
        cls_b_ref,              # (1, CLS_PAD)         f32
        # outputs
        logits_ref,             # (B*MAX_ROLES, CLS_PAD) f32
        constructed_ref,        # (B, IMG_EMB)           f32
        flattened_ref,          # (B, IMG_EMB)           f32
        # scratch
        flat_scr,               # (B, G*C_FEAT)          f32
        gated_scr,              # (B*MAX_ROLES, E)       f32
        rec_scr):               # (B, MAX_ROLES*HID)     f32
    f32 = jnp.float32
    bf16 = jnp.bfloat16

    # ---- convnet (im2col matmul + ReLU), whole batch in one MXU matmul -----
    feat = jnp.dot(patches_ref[...].astype(bf16), conv_w_ref[...],
                   preferred_element_type=f32) + conv_b_ref[...]
    feat = jnp.maximum(feat, 0.0)                           # (B*G, C_FEAT) f32

    # ---- key/value projection, whole batch in one matmul --------------------
    kv = jnp.dot(feat.astype(bf16), kproj_w_ref[...],
                 preferred_element_type=f32) + kproj_b_ref[...]
    kv = jnp.maximum(kv, 0.0)                               # (B*G, E) f32

    # ---- flatten_img( img_features.view(-1, C*H*W) ) ------------------------
    # Regroup feat rows into lane-dense (B, G*C_FEAT) rows via cheap masked
    # vector stores (NCHW flatten order is pre-folded into flat_w), then ONE
    # K = G*C_FEAT matmul for the whole batch.
    for b in range(B):
        for g in range(G):
            r = b * G + g
            flat_scr[b:b + 1, g * C_FEAT:(g + 1) * C_FEAT] = feat[r:r + 1, :]
    flattened = jnp.dot(flat_scr[...].astype(bf16), flat_w_ref[...],
                        preferred_element_type=f32) + flat_b_ref[...]
    flattened_ref[...] = flattened.astype(flattened_ref.dtype)  # single (B,128) store

    # ---- forward_hiddenrep: top-down attention (per batch item, B=2) --------
    role_emb = role_emb_ref[...]                            # (R, E)
    for b in range(B):                                      # static unroll
        kv_b = kv[b * G:(b + 1) * G, :]                     # (G, E) aligned slice
        q = q_base_ref[b:b + 1, :] + role_emb               # (R, E)

        # scores = q . kv^T without materializing kv^T (contract E on both)
        s = lax.dot_general(q.astype(bf16), kv_b.astype(bf16),
                            (((1,), (1,)), ((), ())),
                            preferred_element_type=f32)     # (R, G)
        s = s - jnp.max(s, axis=-1, keepdims=True)
        p = jnp.exp(s)
        p = p * pl.reciprocal(jnp.sum(p, axis=-1, keepdims=True), approx=True)

        att = jnp.dot(p.astype(bf16), kv_b.astype(bf16),
                      preferred_element_type=f32)           # (R, E)
        gated_scr[b * MAX_ROLES:(b + 1) * MAX_ROLES, :] = att * q

    # ---- per-role hidden MLP + classifier, batch-wide ------------------------
    gated = gated_scr[...]                                  # (B*R, E)
    hidden = jnp.dot(gated.astype(bf16), hid_w_ref[...],
                     preferred_element_type=f32) + hid_b_ref[...]
    hidden = jnp.maximum(hidden, 0.0)                       # (B*R, HID)

    logits = jnp.dot(hidden.astype(bf16), cls_w_ref[...],
                     preferred_element_type=f32) + cls_b_ref[...]
    logits_ref[...] = logits.astype(logits_ref.dtype)       # single (12,128) store

    # ---- reconstruct_img( hidden.view(B, R*HID) ) ----------------------------
    for b in range(B):
        for r in range(MAX_ROLES):
            j = b * MAX_ROLES + r
            rec_scr[b:b + 1, r * HID:(r + 1) * HID] = hidden[j:j + 1, :]
    constructed = jnp.dot(rec_scr[...].astype(bf16), rec_w_ref[...],
                          preferred_element_type=f32) + rec_b_ref[...]
    constructed_ref[...] = constructed.astype(constructed_ref.dtype)


# ------------------------------- wrapper -------------------------------------
def im2col(x):
    """x: (B, H, W, C) NHWC -> (B*G, KPAD) patches for the 3x3 stride-2 conv."""
    xp = jnp.pad(x, ((0, 0), (PAD, PAD), (PAD, PAD), (0, 0)))
    cols = []
    for di in range(K):
        for dj in range(K):
            cols.append(xp[:, di:di + STRIDE * OH:STRIDE,
                           dj:dj + STRIDE * OW:STRIDE, :])
    patches = jnp.stack(cols, axis=3)                   # (B, OH, OW, K*K, C_IN)
    patches = patches.reshape(B * G, KDIM)              # b-major rows
    return jnp.pad(patches, ((0, 0), (0, KPAD - KDIM)))   # pad 27 -> 32


def top_down_baseline_forward(params, v_org, gt_verb):
    """v_org: (B, C_IN, H, W) NCHW float32;  gt_verb: (B,) int32."""
    x = jnp.transpose(v_org, (0, 2, 3, 1))               # NCHW -> NHWC
    patches = im2col(x)                                  # (B*G, KPAD)
    # verb-embedding row gather (2 x 64 floats) is pure data plumbing
    q_base = jnp.take(params['verb_emb'], gt_verb, axis=0)   # (B, E)

    vmem_spec = lambda: pl.BlockSpec(memory_space=pltpu.MemorySpace.VMEM)

    logits_pad, constructed_img, flattened_img = pl.pallas_call(
        _fused_forward_kernel,
        out_shape=(
            jax.ShapeDtypeStruct((B * MAX_ROLES, CLS_PAD), DTYPE),
            jax.ShapeDtypeStruct((B, IMG_EMB), DTYPE),
            jax.ShapeDtypeStruct((B, IMG_EMB), DTYPE),
        ),
        in_specs=[vmem_spec() for _ in range(15)],
        out_specs=(vmem_spec(), vmem_spec(), vmem_spec()),
        scratch_shapes=[
            pltpu.VMEM((B, G * C_FEAT), DTYPE),
            pltpu.VMEM((B * MAX_ROLES, E), DTYPE),
            pltpu.VMEM((B, MAX_ROLES * HID), DTYPE),
        ],
    )(patches, q_base,
      params['conv_w'], params['conv_b'],
      params['flat_w'], params['flat_b'],
      params['kproj_w'], params['kproj_b'],
      params['role_emb'],
      params['hid_w'], params['hid_b'],
      params['rec_w'], params['rec_b'],
      params['cls_w'], params['cls_b'])

    role_label_pred = logits_pad[:, :N_LABELS].reshape(B, MAX_ROLES, N_LABELS)
    return role_label_pred, constructed_img, flattened_img


# ----------------------------- parameters ------------------------------------
def init_params(key):
    ks = jax.random.split(key, 8)

    def dense(k, fan_in, fan_out):
        w = jax.random.normal(k, (fan_in, fan_out), DTYPE) / jnp.sqrt(
            jnp.asarray(fan_in, DTYPE))
        b = jnp.zeros((fan_out,), DTYPE)
        return w, b

    raw = {}
    raw['conv_w'], raw['conv_b'] = dense(ks[0], KDIM, C_FEAT)        # convnet
    raw['flat_w'], raw['flat_b'] = dense(ks[1], FLAT_DIM, IMG_EMB)   # flatten_img
    raw['kproj_w'], raw['kproj_b'] = dense(ks[2], C_FEAT, E)         # grid proj
    raw['verb_emb'] = jax.random.normal(ks[3], (N_VERBS, E), DTYPE) * 0.1
    raw['role_emb'] = jax.random.normal(ks[4], (MAX_ROLES, E), DTYPE) * 0.1
    raw['hid_w'], raw['hid_b'] = dense(ks[5], E, HID)                # hidden MLP
    raw['rec_w'], raw['rec_b'] = dense(ks[6], MAX_ROLES * HID, IMG_EMB)
    raw['cls_w'], raw['cls_b'] = dense(ks[7], HID, N_LABELS)         # classifier

    # kernel-ready (bf16 / padded / permuted) parameters
    kp = {}
    kp['conv_w'] = jnp.pad(raw['conv_w'], ((0, KPAD - KDIM), (0, 0))).astype(WDTYPE)
    kp['conv_b'] = raw['conv_b'].reshape(1, C_FEAT)
    # fold the PyTorch NCHW flatten (row index = c*G + g) into grid-major rows
    # (g*C_FEAT + c) to match the kernel's feat-row scatter order.
    kp['flat_w'] = (raw['flat_w'].reshape(C_FEAT, G, IMG_EMB)
                    .transpose(1, 0, 2).reshape(G * C_FEAT, IMG_EMB)).astype(WDTYPE)
    kp['flat_b'] = raw['flat_b'].reshape(1, IMG_EMB)
    kp['kproj_w'] = raw['kproj_w'].astype(WDTYPE)
    kp['kproj_b'] = raw['kproj_b'].reshape(1, E)
    kp['verb_emb'] = raw['verb_emb']
    kp['role_emb'] = raw['role_emb']
    kp['hid_w'] = raw['hid_w'].astype(WDTYPE)
    kp['hid_b'] = raw['hid_b'].reshape(1, HID)
    kp['rec_w'] = raw['rec_w'].astype(WDTYPE)
    kp['rec_b'] = raw['rec_b'].reshape(1, IMG_EMB)
    kp['cls_w'] = jnp.pad(raw['cls_w'],
                          ((0, 0), (0, CLS_PAD - N_LABELS))).astype(WDTYPE)
    kp['cls_b'] = jnp.pad(raw['cls_b'], (0, CLS_PAD - N_LABELS)).reshape(1, CLS_PAD)
    return raw, kp


# --------------------------- pure-JAX reference ------------------------------
def reference_forward(raw, v_org, gt_verb):
    x = jnp.transpose(v_org, (0, 2, 3, 1))
    patches = im2col(x)[:, :KDIM]
    feat = jax.nn.relu(patches @ raw['conv_w'] + raw['conv_b'])      # (B*G, C)
    feat_nchw = jnp.transpose(feat.reshape(B, OH, OW, C_FEAT), (0, 3, 1, 2))
    flattened = feat_nchw.reshape(B, FLAT_DIM) @ raw['flat_w'] + raw['flat_b']
    kv = jax.nn.relu(feat @ raw['kproj_w'] + raw['kproj_b']).reshape(B, G, E)
    q = raw['verb_emb'][gt_verb][:, None, :] + raw['role_emb'][None, :, :]
    s = jnp.einsum('bre,bge->brg', q, kv)
    p = jax.nn.softmax(s, axis=-1)
    att = jnp.einsum('brg,bge->bre', p, kv) * q
    hidden = jax.nn.relu(att.reshape(B * MAX_ROLES, E) @ raw['hid_w'] + raw['hid_b'])
    constructed = hidden.reshape(B, MAX_ROLES * HID) @ raw['rec_w'] + raw['rec_b']
    logits = hidden @ raw['cls_w'] + raw['cls_b']
    return logits.reshape(B, MAX_ROLES, N_LABELS), constructed, flattened


# ---------------------------------- main -------------------------------------
if __name__ == "__main__":
    root = jax.random.PRNGKey(0)
    k_params, k_img, k_verb = jax.random.split(root, 3)

    raw_params, kernel_params = init_params(k_params)
    v_org = jax.random.normal(k_img, (B, C_IN, H_IN, W_IN), DTYPE)   # NCHW
    gt_verb = jax.random.randint(k_verb, (B,), 0, N_VERBS, dtype=jnp.int32)

    fwd = jax.jit(top_down_baseline_forward)
    outs = fwd(kernel_params, v_org, gt_verb)
    jax.block_until_ready(outs)
    role_label_pred, constructed_img, flattened_img = outs

    assert role_label_pred.shape == (B, MAX_ROLES, N_LABELS)
    assert constructed_img.shape == (B, IMG_EMB)
    assert flattened_img.shape == (B, IMG_EMB)

    # sanity-check against a pure-JAX f32 reference (bf16 MXU inputs + approx
    # reciprocal in the kernel -> loose tolerance)
    refs = reference_forward(raw_params, v_org, gt_verb)
    for name, a, r in zip(("role_label_pred", "constructed_img", "flattened_img"),
                          outs, refs):
        if not bool(jnp.allclose(a, r, rtol=2e-2, atol=2e-2)):
            raise AssertionError(
                f"{name} mismatch, max|diff|={float(jnp.max(jnp.abs(a - r)))}")

    print("KERNEL_OK")
</pallas_src>

<mosaic_0001>
module attributes {stable_mosaic.version = 11 : i64} {
  func.func @_fused_forward_kernel(%arg0: memref<32x32xf32, #tpu.memory_space<vmem>>, %arg1: memref<2x64xf32, #tpu.memory_space<vmem>>, %arg2: memref<32x128xbf16, #tpu.memory_space<vmem>>, %arg3: memref<1x128xf32, #tpu.memory_space<vmem>>, %arg4: memref<2048x128xbf16, #tpu.memory_space<vmem>>, %arg5: memref<1x128xf32, #tpu.memory_space<vmem>>, %arg6: memref<128x64xbf16, #tpu.memory_space<vmem>>, %arg7: memref<1x64xf32, #tpu.memory_space<vmem>>, %arg8: memref<6x64xf32, #tpu.memory_space<vmem>>, %arg9: memref<64x128xbf16, #tpu.memory_space<vmem>>, %arg10: memref<1x128xf32, #tpu.memory_space<vmem>>, %arg11: memref<768x128xbf16, #tpu.memory_space<vmem>>, %arg12: memref<1x128xf32, #tpu.memory_space<vmem>>, %arg13: memref<128x128xbf16, #tpu.memory_space<vmem>>, %arg14: memref<1x128xf32, #tpu.memory_space<vmem>>, %arg15: memref<12x128xf32, #tpu.memory_space<vmem>>, %arg16: memref<2x128xf32, #tpu.memory_space<vmem>>, %arg17: memref<2x128xf32, #tpu.memory_space<vmem>>, %arg18: memref<2x2048xf32, #tpu.memory_space<vmem>>, %arg19: memref<12x64xf32, #tpu.memory_space<vmem>>, %arg20: memref<2x768xf32, #tpu.memory_space<vmem>>) attributes {dimension_semantics = [], scalar_prefetch = 0 : i64, scratch_operands = 3 : i64, tpu.core_type = #tpu.core_type<tc>} {
    %c0 = arith.constant 0 : index
    %c0_0 = arith.constant 0 : index
    %0 = vector.load %arg0[%c0, %c0_0] : memref<32x32xf32, #tpu.memory_space<vmem>>, vector<32x32xf32>
    %1 = arith.truncf %0 : vector<32x32xf32> to vector<32x32xbf16>
    %c0_1 = arith.constant 0 : index
    %c0_2 = arith.constant 0 : index
    %2 = vector.load %arg2[%c0_1, %c0_2] : memref<32x128xbf16, #tpu.memory_space<vmem>>, vector<32x128xbf16>
    %cst = arith.constant dense<0.000000e+00> : vector<32x128xf32>
    %3 = tpu.matmul %1, %2, %cst {dimension_numbers = #tpu.dot_dimension_numbers<[1], [0], [0], [1], [0, 0, 1, 1], [], []>} : vector<32x32xbf16>, vector<32x128xbf16>, vector<32x128xf32> -> vector<32x128xf32>
    %c0_3 = arith.constant 0 : index
    %c0_4 = arith.constant 0 : index
    %4 = vector.load %arg3[%c0_3, %c0_4] : memref<1x128xf32, #tpu.memory_space<vmem>>, vector<1x128xf32>
    %5 = vector.broadcast %4 : vector<1x128xf32> to vector<32x128xf32>
    %6 = arith.addf %3, %5 : vector<32x128xf32>
    %cst_5 = arith.constant 0.000000e+00 : f32
    %7 = vector.broadcast %cst_5 : f32 to vector<32x128xf32>
    %8 = arith.maximumf %6, %7 : vector<32x128xf32>
    %9 = arith.truncf %8 : vector<32x128xf32> to vector<32x128xbf16>
    %c0_6 = arith.constant 0 : index
    %c0_7 = arith.constant 0 : index
    %10 = vector.load %arg6[%c0_6, %c0_7] : memref<128x64xbf16, #tpu.memory_space<vmem>>, vector<128x64xbf16>
    %cst_8 = arith.constant dense<0.000000e+00> : vector<32x64xf32>
    %11 = tpu.matmul %9, %10, %cst_8 {dimension_numbers = #tpu.dot_dimension_numbers<[1], [0], [0], [1], [0, 0, 1, 1], [], []>} : vector<32x128xbf16>, vector<128x64xbf16>, vector<32x64xf32> -> vector<32x64xf32>
    %c0_9 = arith.constant 0 : index
    %c0_10 = arith.constant 0 : index
    %12 = vector.load %arg7[%c0_9, %c0_10] : memref<1x64xf32, #tpu.memory_space<vmem>>, vector<1x64xf32>
    %13 = vector.broadcast %12 : vector<1x64xf32> to vector<32x64xf32>
    %14 = arith.addf %11, %13 : vector<32x64xf32>
    %cst_11 = arith.constant 0.000000e+00 : f32
    %15 = vector.broadcast %cst_11 : f32 to vector<32x64xf32>
    %16 = arith.maximumf %14, %15 : vector<32x64xf32>
    %17 = vector.extract_strided_slice %8 {offsets = [0, 0], sizes = [1, 128], strides = [1, 1]} : vector<32x128xf32> to vector<1x128xf32>
    %c0_12 = arith.constant 0 : index
    %c0_13 = arith.constant 0 : index
    %18 = vector.load %arg18[%c0_12, %c0_13] : memref<2x2048xf32, #tpu.memory_space<vmem>>, vector<1x128xf32>
    tpu.vector_store %arg18[%c0_12, %c0_13], %17 {strides = array<i32>} : memref<2x2048xf32, #tpu.memory_space<vmem>>, vector<1x128xf32>,
    %19 = vector.extract_strided_slice %8 {offsets = [1, 0], sizes = [1, 128], strides = [1, 1]} : vector<32x128xf32> to vector<1x128xf32>
    %c0_14 = arith.constant 0 : index
    %c128 = arith.constant 128 : index
    %20 = vector.load %arg18[%c0_14, %c128] : memref<2x2048xf32, #tpu.memory_space<vmem>>, vector<1x128xf32>
    tpu.vector_store %arg18[%c0_14, %c128], %19 {strides = array<i32>} : memref<2x2048xf32, #tpu.memory_space<vmem>>, vector<1x128xf32>,
    %21 = vector.extract_strided_slice %8 {offsets = [2, 0], sizes = [1, 128], strides = [1, 1]} : vector<32x128xf32> to vector<1x128xf32>
    %c0_15 = arith.constant 0 : index
    %c256 = arith.constant 256 : index
    %22 = vector.load %arg18[%c0_15, %c256] : memref<2x2048xf32, #tpu.memory_space<vmem>>, vector<1x128xf32>
    tpu.vector_store %arg18[%c0_15, %c256], %21 {strides = array<i32>} : memref<2x2048xf32, #tpu.memory_space<vmem>>, vector<1x128xf32>,
    %23 = vector.extract_strided_slice %8 {offsets = [3, 0], sizes = [1, 128], strides = [1, 1]} : vector<32x128xf32> to vector<1x128xf32>
    %c0_16 = arith.constant 0 : index
    %c384 = arith.constant 384 : index
    %24 = vector.load %arg18[%c0_16, %c384] : memref<2x2048xf32, #tpu.memory_space<vmem>>, vector<1x128xf32>
    tpu.vector_store %arg18[%c0_16, %c384], %23 {strides = array<i32>} : memref<2x2048xf32, #tpu.memory_space<vmem>>, vector<1x128xf32>,
    %25 = vector.extract_strided_slice %8 {offsets = [4, 0], sizes = [1, 128], strides = [1, 1]} : vector<32x128xf32> to vector<1x128xf32>
    %c0_17 = arith.constant 0 : index
    %c512 = arith.constant 512 : index
    %26 = vector.load %arg18[%c0_17, %c512] : memref<2x2048xf32, #tpu.memory_space<vmem>>, vector<1x128xf32>
    tpu.vector_store %arg18[%c0_17, %c512], %25 {strides = array<i32>} : memref<2x2048xf32, #tpu.memory_space<vmem>>, vector<1x128xf32>,
    %27 = vector.extract_strided_slice %8 {offsets = [5, 0], sizes = [1, 128], strides = [1, 1]} : vector<32x128xf32> to vector<1x128xf32>
    %c0_18 = arith.constant 0 : index
    %c640 = arith.constant 640 : index
    %28 = vector.load %arg18[%c0_18, %c640] : memref<2x2048xf32, #tpu.memory_space<vmem>>, vector<1x128xf32>
    tpu.vector_store %arg18[%c0_18, %c640], %27 {strides = array<i32>} : memref<2x2048xf32, #tpu.memory_space<vmem>>, vector<1x128xf32>,
    %29 = vector.extract_strided_slice %8 {offsets = [6, 0], sizes = [1, 128], strides = [1, 1]} : vector<32x128xf32> to vector<1x128xf32>
    %c0_19 = arith.constant 0 : index
    %c768 = arith.constant 768 : index
    %30 = vector.load %arg18[%c0_19, %c768] : memref<2x2048xf32, #tpu.memory_space<vmem>>, vector<1x128xf32>
    tpu.vector_store %arg18[%c0_19, %c768], %29 {strides = array<i32>} : memref<2x2048xf32, #tpu.memory_space<vmem>>, vector<1x128xf32>,
    %31 = vector.extract_strided_slice %8 {offsets = [7, 0], sizes = [1, 128], strides = [1, 1]} : vector<32x128xf32> to vector<1x128xf32>
    %c0_20 = arith.constant 0 : index
    %c896 = arith.constant 896 : index
    %32 = vector.load %arg18[%c0_20, %c896] : memref<2x2048xf32, #tpu.memory_space<vmem>>, vector<1x128xf32>
    tpu.vector_store %arg18[%c0_20, %c896], %31 {strides = array<i32>} : memref<2x2048xf32, #tpu.memory_space<vmem>>, vector<1x128xf32>,
    %33 = vector.extract_strided_slice %8 {offsets = [8, 0], sizes = [1, 128], strides = [1, 1]} : vector<32x128xf32> to vector<1x128xf32>
    %c0_21 = arith.constant 0 : index
    %c1024 = arith.constant 1024 : index
    %34 = vector.load %arg18[%c0_21, %c1024] : memref<2x2048xf32, #tpu.memory_space<vmem>>, vector<1x128xf32>
    tpu.vector_store %arg18[%c0_21, %c1024], %33 {strides = array<i32>} : memref<2x2048xf32, #tpu.memory_space<vmem>>, vector<1x128xf32>,
    %35 = vector.extract_strided_slice %8 {offsets = [9, 0], sizes = [1, 128], strides = [1, 1]} : vector<32x128xf32> to vector<1x128xf32>
    %c0_22 = arith.constant 0 : index
    %c1152 = arith.constant 1152 : index
    %36 = vector.load %arg18[%c0_22, %c1152] : memref<2x2048xf32, #tpu.memory_space<vmem>>, vector<1x128xf32>
    tpu.vector_store %arg18[%c0_22, %c1152], %35 {strides = array<i32>} : memref<2x2048xf32, #tpu.memory_space<vmem>>, vector<1x128xf32>,
    %37 = vector.extract_strided_slice %8 {offsets = [10, 0], sizes = [1, 128], strides = [1, 1]} : vector<32x128xf32> to vector<1x128xf32>
    %c0_23 = arith.constant 0 : index
    %c1280 = arith.constant 1280 : index
    %38 = vector.load %arg18[%c0_23, %c1280] : memref<2x2048xf32, #tpu.memory_space<vmem>>, vector<1x128xf32>
    tpu.vector_store %arg18[%c0_23, %c1280], %37 {strides = array<i32>} : memref<2x2048xf32, #tpu.memory_space<vmem>>, vector<1x128xf32>,
    %39 = vector.extract_strided_slice %8 {offsets = [11, 0], sizes = [1, 128], strides = [1, 1]} : vector<32x128xf32> to vector<1x128xf32>
    %c0_24 = arith.constant 0 : index
    %c1408 = arith.constant 1408 : index
    %40 = vector.load %arg18[%c0_24, %c1408] : memref<2x2048xf32, #tpu.memory_space<vmem>>, vector<1x128xf32>
    tpu.vector_store %arg18[%c0_24, %c1408], %39 {strides = array<i32>} : memref<2x2048xf32, #tpu.memory_space<vmem>>, vector<1x128xf32>,
    %41 = vector.extract_strided_slice %8 {offsets = [12, 0], sizes = [1, 128], strides = [1, 1]} : vector<32x128xf32> to vector<1x128xf32>
    %c0_25 = arith.constant 0 : index
    %c1536 = arith.constant 1536 : index
    %42 = vector.load %arg18[%c0_25, %c1536] : memref<2x2048xf32, #tpu.memory_space<vmem>>, vector<1x128xf32>
    tpu.vector_store %arg18[%c0_25, %c1536], %41 {strides = array<i32>} : memref<2x2048xf32, #tpu.memory_space<vmem>>, vector<1x128xf32>,
    %43 = vector.extract_strided_slice %8 {offsets = [13, 0], sizes = [1, 128], strides = [1, 1]} : vector<32x128xf32> to vector<1x128xf32>
    %c0_26 = arith.constant 0 : index
    %c1664 = arith.constant 1664 : index
    %44 = vector.load %arg18[%c0_26, %c1664] : memref<2x2048xf32, #tpu.memory_space<vmem>>, vector<1x128xf32>
    tpu.vector_store %arg18[%c0_26, %c1664], %43 {strides = array<i32>} : memref<2x2048xf32, #tpu.memory_space<vmem>>, vector<1x128xf32>,
    %45 = vector.extract_strided_slice %8 {offsets = [14, 0], sizes = [1, 128], strides = [1, 1]} : vector<32x128xf32> to vector<1x128xf32>
    %c0_27 = arith.constant 0 : index
    %c1792 = arith.constant 1792 : index
    %46 = vector.load %arg18[%c0_27, %c1792] : memref<2x2048xf32, #tpu.memory_space<vmem>>, vector<1x128xf32>
    tpu.vector_store %arg18[%c0_27, %c1792], %45 {strides = array<i32>} : memref<2x2048xf32, #tpu.memory_space<vmem>>, vector<1x128xf32>,
    %47 = vector.extract_strided_slice %8 {offsets = [15, 0], sizes = [1, 128], strides = [1, 1]} : vector<32x128xf32> to vector<1x128xf32>
    %c0_28 = arith.constant 0 : index
    %c1920 = arith.constant 1920 : index
    %48 = vector.load %arg18[%c0_28, %c1920] : memref<2x2048xf32, #tpu.memory_space<vmem>>, vector<1x128xf32>
    tpu.vector_store %arg18[%c0_28, %c1920], %47 {strides = array<i32>} : memref<2x2048xf32, #tpu.memory_space<vmem>>, vector<1x128xf32>,
    %49 = vector.extract_strided_slice %8 {offsets = [16, 0], sizes = [1, 128], strides = [1, 1]} : vector<32x128xf32> to vector<1x128xf32>
    %c1 = arith.constant 1 : index
    %c0_29 = arith.constant 0 : index
    %50 = vector.load %arg18[%c1, %c0_29] : memref<2x2048xf32, #tpu.memory_space<vmem>>, vector<1x128xf32>
    tpu.vector_store %arg18[%c1, %c0_29], %49 {strides = array<i32>} : memref<2x2048xf32, #tpu.memory_space<vmem>>, vector<1x128xf32>,
    %51 = vector.extract_strided_slice %8 {offsets = [17, 0], sizes = [1, 128], strides = [1, 1]} : vector<32x128xf32> to vector<1x128xf32>
    %c1_30 = arith.constant 1 : index
    %c128_31 = arith.constant 128 : index
    %52 = vector.load %arg18[%c1_30, %c128_31] : memref<2x2048xf32, #tpu.memory_space<vmem>>, vector<1x128xf32>
    tpu.vector_store %arg18[%c1_30, %c128_31], %51 {strides = array<i32>} : memref<2x2048xf32, #tpu.memory_space<vmem>>, vector<1x128xf32>,
    %53 = vector.extract_strided_slice %8 {offsets = [18, 0], sizes = [1, 128], strides = [1, 1]} : vector<32x128xf32> to vector<1x128xf32>
    %c1_32 = arith.constant 1 : index
    %c256_33 = arith.constant 256 : index
    %54 = vector.load %arg18[%c1_32, %c256_33] : memref<2x2048xf32, #tpu.memory_space<vmem>>, vector<1x128xf32>
    tpu.vector_store %arg18[%c1_32, %c256_33], %53 {strides = array<i32>} : memref<2x2048xf32, #tpu.memory_space<vmem>>, vector<1x128xf32>,
    %55 = vector.extract_strided_slice %8 {offsets = [19, 0], sizes = [1, 128], strides = [1, 1]} : vector<32x128xf32> to vector<1x128xf32>
    %c1_34 = arith.constant 1 : index
    %c384_35 = arith.constant 384 : index
    %56 = vector.load %arg18[%c1_34, %c384_35] : memref<2x2048xf32, #tpu.memory_space<vmem>>, vector<1x128xf32>
    tpu.vector_store %arg18[%c1_34, %c384_35], %55 {strides = array<i32>} : memref<2x2048xf32, #tpu.memory_space<vmem>>, vector<1x128xf32>,
    %57 = vector.extract_strided_slice %8 {offsets = [20, 0], sizes = [1, 128], strides = [1, 1]} : vector<32x128xf32> to vector<1x128xf32>
    %c1_36 = arith.constant 1 : index
    %c512_37 = arith.constant 512 : index
    %58 = vector.load %arg18[%c1_36, %c512_37] : memref<2x2048xf32, #tpu.memory_space<vmem>>, vector<1x128xf32>
    tpu.vector_store %arg18[%c1_36, %c512_37], %57 {strides = array<i32>} : memref<2x2048xf32, #tpu.memory_space<vmem>>, vector<1x128xf32>,
    %59 = vector.extract_strided_slice %8 {offsets = [21, 0], sizes = [1, 128], strides = [1, 1]} : vector<32x128xf32> to vector<1x128xf32>
    %c1_38 = arith.constant 1 : index
    %c640_39 = arith.constant 640 : index
    %60 = vector.load %arg18[%c1_38, %c640_39] : memref<2x2048xf32, #tpu.memory_space<vmem>>, vector<1x128xf32>
    tpu.vector_store %arg18[%c1_38, %c640_39], %59 {strides = array<i32>} : memref<2x2048xf32, #tpu.memory_space<vmem>>, vector<1x128xf32>,
    %61 = vector.extract_strided_slice %8 {offsets = [22, 0], sizes = [1, 128], strides = [1, 1]} : vector<32x128xf32> to vector<1x128xf32>
    %c1_40 = arith.constant 1 : index
    %c768_41 = arith.constant 768 : index
    %62 = vector.load %arg18[%c1_40, %c768_41] : memref<2x2048xf32, #tpu.memory_space<vmem>>, vector<1x128xf32>
    tpu.vector_store %arg18[%c1_40, %c768_41], %61 {strides = array<i32>} : memref<2x2048xf32, #tpu.memory_space<vmem>>, vector<1x128xf32>,
    %63 = vector.extract_strided_slice %8 {offsets = [23, 0], sizes = [1, 128], strides = [1, 1]} : vector<32x128xf32> to vector<1x128xf32>
    %c1_42 = arith.constant 1 : index
    %c896_43 = arith.constant 896 : index
    %64 = vector.load %arg18[%c1_42, %c896_43] : memref<2x2048xf32, #tpu.memory_space<vmem>>, vector<1x128xf32>
    tpu.vector_store %arg18[%c1_42, %c896_43], %63 {strides = array<i32>} : memref<2x2048xf32, #tpu.memory_space<vmem>>, vector<1x128xf32>,
    %65 = vector.extract_strided_slice %8 {offsets = [24, 0], sizes = [1, 128], strides = [1, 1]} : vector<32x128xf32> to vector<1x128xf32>
    %c1_44 = arith.constant 1 : index
    %c1024_45 = arith.constant 1024 : index
    %66 = vector.load %arg18[%c1_44, %c1024_45] : memref<2x2048xf32, #tpu.memory_space<vmem>>, vector<1x128xf32>
    tpu.vector_store %arg18[%c1_44, %c1024_45], %65 {strides = array<i32>} : memref<2x2048xf32, #tpu.memory_space<vmem>>, vector<1x128xf32>,
    %67 = vector.extract_strided_slice %8 {offsets = [25, 0], sizes = [1, 128], strides = [1, 1]} : vector<32x128xf32> to vector<1x128xf32>
    %c1_46 = arith.constant 1 : index
    %c1152_47 = arith.constant 1152 : index
    %68 = vector.load %arg18[%c1_46, %c1152_47] : memref<2x2048xf32, #tpu.memory_space<vmem>>, vector<1x128xf32>
    tpu.vector_store %arg18[%c1_46, %c1152_47], %67 {strides = array<i32>} : memref<2x2048xf32, #tpu.memory_space<vmem>>, vector<1x128xf32>,
    %69 = vector.extract_strided_slice %8 {offsets = [26, 0], sizes = [1, 128], strides = [1, 1]} : vector<32x128xf32> to vector<1x128xf32>
    %c1_48 = arith.constant 1 : index
    %c1280_49 = arith.constant 1280 : index
    %70 = vector.load %arg18[%c1_48, %c1280_49] : memref<2x2048xf32, #tpu.memory_space<vmem>>, vector<1x128xf32>
    tpu.vector_store %arg18[%c1_48, %c1280_49], %69 {strides = array<i32>} : memref<2x2048xf32, #tpu.memory_space<vmem>>, vector<1x128xf32>,
    %71 = vector.extract_strided_slice %8 {offsets = [27, 0], sizes = [1, 128], strides = [1, 1]} : vector<32x128xf32> to vector<1x128xf32>
    %c1_50 = arith.constant 1 : index
    %c1408_51 = arith.constant 1408 : index
    %72 = vector.load %arg18[%c1_50, %c1408_51] : memref<2x2048xf32, #tpu.memory_space<vmem>>, vector<1x128xf32>
    tpu.vector_store %arg18[%c1_50, %c1408_51], %71 {strides = array<i32>} : memref<2x2048xf32, #tpu.memory_space<vmem>>, vector<1x128xf32>,
    %73 = vector.extract_strided_slice %8 {offsets = [28, 0], sizes = [1, 128], strides = [1, 1]} : vector<32x128xf32> to vector<1x128xf32>
    %c1_52 = arith.constant 1 : index
    %c1536_53 = arith.constant 1536 : index
    %74 = vector.load %arg18[%c1_52, %c1536_53] : memref<2x2048xf32, #tpu.memory_space<vmem>>, vector<1x128xf32>
    tpu.vector_store %arg18[%c1_52, %c1536_53], %73 {strides = array<i32>} : memref<2x2048xf32, #tpu.memory_space<vmem>>, vector<1x128xf32>,
    %75 = vector.extract_strided_slice %8 {offsets = [29, 0], sizes = [1, 128], strides = [1, 1]} : vector<32x128xf32> to vector<1x128xf32>
    %c1_54 = arith.constant 1 : index
    %c1664_55 = arith.constant 1664 : index
    %76 = vector.load %arg18[%c1_54, %c1664_55] : memref<2x2048xf32, #tpu.memory_space<vmem>>, vector<1x128xf32>
    tpu.vector_store %arg18[%c1_54, %c1664_55], %75 {strides = array<i32>} : memref<2x2048xf32, #tpu.memory_space<vmem>>, vector<1x128xf32>,
    %77 = vector.extract_strided_slice %8 {offsets = [30, 0], sizes = [1, 128], strides = [1, 1]} : vector<32x128xf32> to vector<1x128xf32>
    %c1_56 = arith.constant 1 : index
    %c1792_57 = arith.constant 1792 : index
    %78 = vector.load %arg18[%c1_56, %c1792_57] : memref<2x2048xf32, #tpu.memory_space<vmem>>, vector<1x128xf32>
    tpu.vector_store %arg18[%c1_56, %c1792_57], %77 {strides = array<i32>} : memref<2x2048xf32, #tpu.memory_space<vmem>>, vector<1x128xf32>,
    %79 = vector.extract_strided_slice %8 {offsets = [31, 0], sizes = [1, 128], strides = [1, 1]} : vector<32x128xf32> to vector<1x128xf32>
    %c1_58 = arith.constant 1 : index
    %c1920_59 = arith.constant 1920 : index
    %80 = vector.load %arg18[%c1_58, %c1920_59] : memref<2x2048xf32, #tpu.memory_space<vmem>>, vector<1x128xf32>
    tpu.vector_store %arg18[%c1_58, %c1920_59], %79 {strides = array<i32>} : memref<2x2048xf32, #tpu.memory_space<vmem>>, vector<1x128xf32>,
    %c0_60 = arith.constant 0 : index
    %c0_61 = arith.constant 0 : index
    %81 = vector.load %arg18[%c0_60, %c0_61] : memref<2x2048xf32, #tpu.memory_space<vmem>>, vector<2x2048xf32>
    %82 = arith.truncf %81 : vector<2x2048xf32> to vector<2x2048xbf16>
    %c0_62 = arith.constant 0 : index
    %c0_63 = arith.constant 0 : index
    %83 = vector.load %arg4[%c0_62, %c0_63] : memref<2048x128xbf16, #tpu.memory_space<vmem>>, vector<2048x128xbf16>
    %cst_64 = arith.constant dense<0.000000e+00> : vector<2x128xf32>
    %84 = tpu.matmul %82, %83, %cst_64 {dimension_numbers = #tpu.dot_dimension_numbers<[1], [0], [0], [1], [0, 0, 1, 1], [], []>} : vector<2x2048xbf16>, vector<2048x128xbf16>, vector<2x128xf32> -> vector<2x128xf32>
    %c0_65 = arith.constant 0 : index
    %c0_66 = arith.constant 0 : index
    %85 = vector.load %arg5[%c0_65, %c0_66] : memref<1x128xf32, #tpu.memory_space<vmem>>, vector<1x128xf32>
    %86 = vector.broadcast %85 : vector<1x128xf32> to vector<2x128xf32>
    %87 = arith.addf %84, %86 : vector<2x128xf32>
    %c0_67 = arith.constant 0 : index
    %c0_68 = arith.constant 0 : index
    %88 = vector.load %arg17[%c0_67, %c0_68] : memref<2x128xf32, #tpu.memory_space<vmem>>, vector<2x128xf32>
    tpu.vector_store %arg17[%c0_67, %c0_68], %87 {strides = array<i32>} : memref<2x128xf32, #tpu.memory_space<vmem>>, vector<2x128xf32>,
    %c0_69 = arith.constant 0 : index
    %c0_70 = arith.constant 0 : index
    %89 = vector.load %arg8[%c0_69, %c0_70] : memref<6x64xf32, #tpu.memory_space<vmem>>, vector<6x64xf32>
    %90 = vector.extract_strided_slice %16 {offsets = [0, 0], sizes = [16, 64], strides = [1, 1]} : vector<32x64xf32> to vector<16x64xf32>
    %c0_71 = arith.constant 0 : index
    %c0_72 = arith.constant 0 : index
    %91 = vector.load %arg1[%c0_71, %c0_72] : memref<2x64xf32, #tpu.memory_space<vmem>>, vector<1x64xf32>
    %92 = vector.broadcast %91 : vector<1x64xf32> to vector<6x64xf32>
    %93 = arith.addf %92, %89 : vector<6x64xf32>
    %94 = arith.truncf %93 : vector<6x64xf32> to vector<6x64xbf16>
    %95 = arith.truncf %90 : vector<16x64xf32> to vector<16x64xbf16>
    %cst_73 = arith.constant dense<0.000000e+00> : vector<6x16xf32>
    %96 = tpu.matmul %94, %95, %cst_73 {dimension_numbers = #tpu.dot_dimension_numbers<[1], [1], [0], [0], [0, 0, 1, 0], [], []>} : vector<6x64xbf16>, vector<16x64xbf16>, vector<6x16xf32> -> vector<6x16xf32>
    %cst_74 = arith.constant dense<0xFF800000> : vector<6xf32>
    %97 = vector.multi_reduction <maximumf>, %96, %cst_74 [1] : vector<6x16xf32> to vector<6xf32>
    %98 = vector.shape_cast %97 : vector<6xf32> to vector<6x1xf32>
    %99 = vector.broadcast %98 : vector<6x1xf32> to vector<6x16xf32>
    %100 = arith.subf %96, %99 : vector<6x16xf32>
    %101 = math.exp %100 : vector<6x16xf32>
    %cst_75 = arith.constant dense<0.000000e+00> : vector<6xf32>
    %102 = vector.multi_reduction <add>, %101, %cst_75 [1] : vector<6x16xf32> to vector<6xf32>
    %103 = vector.shape_cast %102 : vector<6xf32> to vector<6x1xf32>
    %104 = tpu.reciprocal %103 {approx = true} : vector<6x1xf32> -> vector<6x1xf32>
    %105 = vector.broadcast %104 : vector<6x1xf32> to vector<6x16xf32>
    %106 = arith.mulf %101, %105 : vector<6x16xf32>
    %107 = arith.truncf %106 : vector<6x16xf32> to vector<6x16xbf16>
    %108 = arith.truncf %90 : vector<16x64xf32> to vector<16x64xbf16>
    %cst_76 = arith.constant dense<0.000000e+00> : vector<6x64xf32>
    %109 = tpu.matmul %107, %108, %cst_76 {dimension_numbers = #tpu.dot_dimension_numbers<[1], [0], [0], [1], [0, 0, 1, 1], [], []>} : vector<6x16xbf16>, vector<16x64xbf16>, vector<6x64xf32> -> vector<6x64xf32>
    %110 = arith.mulf %109, %93 : vector<6x64xf32>
    %c0_77 = arith.constant 0 : index
    %c0_78 = arith.constant 0 : index
    %111 = vector.load %arg19[%c0_77, %c0_78] : memref<12x64xf32, #tpu.memory_space<vmem>>, vector<6x64xf32>
    tpu.vector_store %arg19[%c0_77, %c0_78], %110 {strides = array<i32>} : memref<12x64xf32, #tpu.memory_space<vmem>>, vector<6x64xf32>,
    %112 = vector.extract_strided_slice %16 {offsets = [16, 0], sizes = [16, 64], strides = [1, 1]} : vector<32x64xf32> to vector<16x64xf32>
    %c1_79 = arith.constant 1 : index
    %c0_80 = arith.constant 0 : index
    %113 = vector.load %arg1[%c1_79, %c0_80] : memref<2x64xf32, #tpu.memory_space<vmem>>, vector<1x64xf32>
    %114 = vector.broadcast %113 : vector<1x64xf32> to vector<6x64xf32>
    %115 = arith.addf %114, %89 : vector<6x64xf32>
    %116 = arith.truncf %115 : vector<6x64xf32> to vector<6x64xbf16>
    %117 = arith.truncf %112 : vector<16x64xf32> to vector<16x64xbf16>
    %cst_81 = arith.constant dense<0.000000e+00> : vector<6x16xf32>
    %118 = tpu.matmul %116, %117, %cst_81 {dimension_numbers = #tpu.dot_dimension_numbers<[1], [1], [0], [0], [0, 0, 1, 0], [], []>} : vector<6x64xbf16>, vector<16x64xbf16>, vector<6x16xf32> -> vector<6x16xf32>
    %cst_82 = arith.constant dense<0xFF800000> : vector<6xf32>
    %119 = vector.multi_reduction <maximumf>, %118, %cst_82 [1] : vector<6x16xf32> to vector<6xf32>
    %120 = vector.shape_cast %119 : vector<6xf32> to vector<6x1xf32>
    %121 = vector.broadcast %120 : vector<6x1xf32> to vector<6x16xf32>
    %122 = arith.subf %118, %121 : vector<6x16xf32>
    %123 = math.exp %122 : vector<6x16xf32>
    %cst_83 = arith.constant dense<0.000000e+00> : vector<6xf32>
    %124 = vector.multi_reduction <add>, %123, %cst_83 [1] : vector<6x16xf32> to vector<6xf32>
    %125 = vector.shape_cast %124 : vector<6xf32> to vector<6x1xf32>
    %126 = tpu.reciprocal %125 {approx = true} : vector<6x1xf32> -> vector<6x1xf32>
    %127 = vector.broadcast %126 : vector<6x1xf32> to vector<6x16xf32>
    %128 = arith.mulf %123, %127 : vector<6x16xf32>
    %129 = arith.truncf %128 : vector<6x16xf32> to vector<6x16xbf16>
    %130 = arith.truncf %112 : vector<16x64xf32> to vector<16x64xbf16>
    %cst_84 = arith.constant dense<0.000000e+00> : vector<6x64xf32>
    %131 = tpu.matmul %129, %130, %cst_84 {dimension_numbers = #tpu.dot_dimension_numbers<[1], [0], [0], [1], [0, 0, 1, 1], [], []>} : vector<6x16xbf16>, vector<16x64xbf16>, vector<6x64xf32> -> vector<6x64xf32>
    %132 = arith.mulf %131, %115 : vector<6x64xf32>
    %c6 = arith.constant 6 : index
    %c0_85 = arith.constant 0 : index
    %133 = vector.load %arg19[%c6, %c0_85] : memref<12x64xf32, #tpu.memory_space<vmem>>, vector<6x64xf32>
    tpu.vector_store %arg19[%c6, %c0_85], %132 {strides = array<i32>} : memref<12x64xf32, #tpu.memory_space<vmem>>, vector<6x64xf32>,
    %c0_86 = arith.constant 0 : index
    %c0_87 = arith.constant 0 : index
    %134 = vector.load %arg19[%c0_86, %c0_87] : memref<12x64xf32, #tpu.memory_space<vmem>>, vector<12x64xf32>
    %135 = arith.truncf %134 : vector<12x64xf32> to vector<12x64xbf16>
    %c0_88 = arith.constant 0 : index
    %c0_89 = arith.constant 0 : index
    %136 = vector.load %arg9[%c0_88, %c0_89] : memref<64x128xbf16, #tpu.memory_space<vmem>>, vector<64x128xbf16>
    %cst_90 = arith.constant dense<0.000000e+00> : vector<12x128xf32>
    %137 = tpu.matmul %135, %136, %cst_90 {dimension_numbers = #tpu.dot_dimension_numbers<[1], [0], [0], [1], [0, 0, 1, 1], [], []>} : vector<12x64xbf16>, vector<64x128xbf16>, vector<12x128xf32> -> vector<12x128xf32>
    %c0_91 = arith.constant 0 : index
    %c0_92 = arith.constant 0 : index
    %138 = vector.load %arg10[%c0_91, %c0_92] : memref<1x128xf32, #tpu.memory_space<vmem>>, vector<1x128xf32>
    %139 = vector.broadcast %138 : vector<1x128xf32> to vector<12x128xf32>
    %140 = arith.addf %137, %139 : vector<12x128xf32>
    %cst_93 = arith.constant 0.000000e+00 : f32
    %141 = vector.broadcast %cst_93 : f32 to vector<12x128xf32>
    %142 = arith.maximumf %140, %141 : vector<12x128xf32>
    %143 = arith.truncf %142 : vector<12x128xf32> to vector<12x128xbf16>
    %c0_94 = arith.constant 0 : index
    %c0_95 = arith.constant 0 : index
    %144 = vector.load %arg13[%c0_94, %c0_95] : memref<128x128xbf16, #tpu.memory_space<vmem>>, vector<128x128xbf16>
    %cst_96 = arith.constant dense<0.000000e+00> : vector<12x128xf32>
    %145 = tpu.matmul %143, %144, %cst_96 {dimension_numbers = #tpu.dot_dimension_numbers<[1], [0], [0], [1], [0, 0, 1, 1], [], []>} : vector<12x128xbf16>, vector<128x128xbf16>, vector<12x128xf32> -> vector<12x128xf32>
    %c0_97 = arith.constant 0 : index
    %c0_98 = arith.constant 0 : index
    %146 = vector.load %arg14[%c0_97, %c0_98] : memref<1x128xf32, #tpu.memory_space<vmem>>, vector<1x128xf32>
    %147 = vector.broadcast %146 : vector<1x128xf32> to vector<12x128xf32>
    %148 = arith.addf %145, %147 : vector<12x128xf32>
    %c0_99 = arith.constant 0 : index
    %c0_100 = arith.constant 0 : index
    %149 = vector.load %arg15[%c0_99, %c0_100] : memref<12x128xf32, #tpu.memory_space<vmem>>, vector<12x128xf32>
    tpu.vector_store %arg15[%c0_99, %c0_100], %148 {strides = array<i32>} : memref<12x128xf32, #tpu.memory_space<vmem>>, vector<12x128xf32>,
    %150 = vector.extract_strided_slice %142 {offsets = [0, 0], sizes = [1, 128], strides = [1, 1]} : vector<12x128xf32> to vector<1x128xf32>
    %c0_101 = arith.constant 0 : index
    %c0_102 = arith.constant 0 : index
    %151 = vector.load %arg20[%c0_101, %c0_102] : memref<2x768xf32, #tpu.memory_space<vmem>>, vector<1x128xf32>
    tpu.vector_store %arg20[%c0_101, %c0_102], %150 {strides = array<i32>} : memref<2x768xf32, #tpu.memory_space<vmem>>, vector<1x128xf32>,
    %152 = vector.extract_strided_slice %142 {offsets = [1, 0], sizes = [1, 128], strides = [1, 1]} : vector<12x128xf32> to vector<1x128xf32>
    %c0_103 = arith.constant 0 : index
    %c128_104 = arith.constant 128 : index
    %153 = vector.load %arg20[%c0_103, %c128_104] : memref<2x768xf32, #tpu.memory_space<vmem>>, vector<1x128xf32>
    tpu.vector_store %arg20[%c0_103, %c128_104], %152 {strides = array<i32>} : memref<2x768xf32, #tpu.memory_space<vmem>>, vector<1x128xf32>,
    %154 = vector.extract_strided_slice %142 {offsets = [2, 0], sizes = [1, 128], strides = [1, 1]} : vector<12x128xf32> to vector<1x128xf32>
    %c0_105 = arith.constant 0 : index
    %c256_106 = arith.constant 256 : index
    %155 = vector.load %arg20[%c0_105, %c256_106] : memref<2x768xf32, #tpu.memory_space<vmem>>, vector<1x128xf32>
    tpu.vector_store %arg20[%c0_105, %c256_106], %154 {strides = array<i32>} : memref<2x768xf32, #tpu.memory_space<vmem>>, vector<1x128xf32>,
    %156 = vector.extract_strided_slice %142 {offsets = [3, 0], sizes = [1, 128], strides = [1, 1]} : vector<12x128xf32> to vector<1x128xf32>
    %c0_107 = arith.constant 0 : index
    %c384_108 = arith.constant 384 : index
    %157 = vector.load %arg20[%c0_107, %c384_108] : memref<2x768xf32, #tpu.memory_space<vmem>>, vector<1x128xf32>
    tpu.vector_store %arg20[%c0_107, %c384_108], %156 {strides = array<i32>} : memref<2x768xf32, #tpu.memory_space<vmem>>, vector<1x128xf32>,
    %158 = vector.extract_strided_slice %142 {offsets = [4, 0], sizes = [1, 128], strides = [1, 1]} : vector<12x128xf32> to vector<1x128xf32>
    %c0_109 = arith.constant 0 : index
    %c512_110 = arith.constant 512 : index
    %159 = vector.load %arg20[%c0_109, %c512_110] : memref<2x768xf32, #tpu.memory_space<vmem>>, vector<1x128xf32>
    tpu.vector_store %arg20[%c0_109, %c512_110], %158 {strides = array<i32>} : memref<2x768xf32, #tpu.memory_space<vmem>>, vector<1x128xf32>,
    %160 = vector.extract_strided_slice %142 {offsets = [5, 0], sizes = [1, 128], strides = [1, 1]} : vector<12x128xf32> to vector<1x128xf32>
    %c0_111 = arith.constant 0 : index
    %c640_112 = arith.constant 640 : index
    %161 = vector.load %arg20[%c0_111, %c640_112] : memref<2x768xf32, #tpu.memory_space<vmem>>, vector<1x128xf32>
    tpu.vector_store %arg20[%c0_111, %c640_112], %160 {strides = array<i32>} : memref<2x768xf32, #tpu.memory_space<vmem>>, vector<1x128xf32>,
    %162 = vector.extract_strided_slice %142 {offsets = [6, 0], sizes = [1, 128], strides = [1, 1]} : vector<12x128xf32> to vector<1x128xf32>
    %c1_113 = arith.constant 1 : index
    %c0_114 = arith.constant 0 : index
    %163 = vector.load %arg20[%c1_113, %c0_114] : memref<2x768xf32, #tpu.memory_space<vmem>>, vector<1x128xf32>
    tpu.vector_store %arg20[%c1_113, %c0_114], %162 {strides = array<i32>} : memref<2x768xf32, #tpu.memory_space<vmem>>, vector<1x128xf32>,
    %164 = vector.extract_strided_slice %142 {offsets = [7, 0], sizes = [1, 128], strides = [1, 1]} : vector<12x128xf32> to vector<1x128xf32>
    %c1_115 = arith.constant 1 : index
    %c128_116 = arith.constant 128 : index
    %165 = vector.load %arg20[%c1_115, %c128_116] : memref<2x768xf32, #tpu.memory_space<vmem>>, vector<1x128xf32>
    tpu.vector_store %arg20[%c1_115, %c128_116], %164 {strides = array<i32>} : memref<2x768xf32, #tpu.memory_space<vmem>>, vector<1x128xf32>,
    %166 = vector.extract_strided_slice %142 {offsets = [8, 0], sizes = [1, 128], strides = [1, 1]} : vector<12x128xf32> to vector<1x128xf32>
    %c1_117 = arith.constant 1 : index
    %c256_118 = arith.constant 256 : index
    %167 = vector.load %arg20[%c1_117, %c256_118] : memref<2x768xf32, #tpu.memory_space<vmem>>, vector<1x128xf32>
    tpu.vector_store %arg20[%c1_117, %c256_118], %166 {strides = array<i32>} : memref<2x768xf32, #tpu.memory_space<vmem>>, vector<1x128xf32>,
    %168 = vector.extract_strided_slice %142 {offsets = [9, 0], sizes = [1, 128], strides = [1, 1]} : vector<12x128xf32> to vector<1x128xf32>
    %c1_119 = arith.constant 1 : index
    %c384_120 = arith.constant 384 : index
    %169 = vector.load %arg20[%c1_119, %c384_120] : memref<2x768xf32, #tpu.memory_space<vmem>>, vector<1x128xf32>
    tpu.vector_store %arg20[%c1_119, %c384_120], %168 {strides = array<i32>} : memref<2x768xf32, #tpu.memory_space<vmem>>, vector<1x128xf32>,
    %170 = vector.extract_strided_slice %142 {offsets = [10, 0], sizes = [1, 128], strides = [1, 1]} : vector<12x128xf32> to vector<1x128xf32>
    %c1_121 = arith.constant 1 : index
    %c512_122 = arith.constant 512 : index
    %171 = vector.load %arg20[%c1_121, %c512_122] : memref<2x768xf32, #tpu.memory_space<vmem>>, vector<1x128xf32>
    tpu.vector_store %arg20[%c1_121, %c512_122], %170 {strides = array<i32>} : memref<2x768xf32, #tpu.memory_space<vmem>>, vector<1x128xf32>,
    %172 = vector.extract_strided_slice %142 {offsets = [11, 0], sizes = [1, 128], strides = [1, 1]} : vector<12x128xf32> to vector<1x128xf32>
    %c1_123 = arith.constant 1 : index
    %c640_124 = arith.constant 640 : index
    %173 = vector.load %arg20[%c1_123, %c640_124] : memref<2x768xf32, #tpu.memory_space<vmem>>, vector<1x128xf32>
    tpu.vector_store %arg20[%c1_123, %c640_124], %172 {strides = array<i32>} : memref<2x768xf32, #tpu.memory_space<vmem>>, vector<1x128xf32>,
    %c0_125 = arith.constant 0 : index
    %c0_126 = arith.constant 0 : index
    %174 = vector.load %arg20[%c0_125, %c0_126] : memref<2x768xf32, #tpu.memory_space<vmem>>, vector<2x768xf32>
    %175 = arith.truncf %174 : vector<2x768xf32> to vector<2x768xbf16>
    %c0_127 = arith.constant 0 : index
    %c0_128 = arith.constant 0 : index
    %176 = vector.load %arg11[%c0_127, %c0_128] : memref<768x128xbf16, #tpu.memory_space<vmem>>, vector<768x128xbf16>
    %cst_129 = arith.constant dense<0.000000e+00> : vector<2x128xf32>
    %177 = tpu.matmul %175, %176, %cst_129 {dimension_numbers = #tpu.dot_dimension_numbers<[1], [0], [0], [1], [0, 0, 1, 1], [], []>} : vector<2x768xbf16>, vector<768x128xbf16>, vector<2x128xf32> -> vector<2x128xf32>
    %c0_130 = arith.constant 0 : index
    %c0_131 = arith.constant 0 : index
    %178 = vector.load %arg12[%c0_130, %c0_131] : memref<1x128xf32, #tpu.memory_space<vmem>>, vector<1x128xf32>
    %179 = vector.broadcast %178 : vector<1x128xf32> to vector<2x128xf32>
    %180 = arith.addf %177, %179 : vector<2x128xf32>
    %c0_132 = arith.constant 0 : index
    %c0_133 = arith.constant 0 : index
    %181 = vector.load %arg16[%c0_132, %c0_133] : memref<2x128xf32, #tpu.memory_space<vmem>>, vector<2x128xf32>
    tpu.vector_store %arg16[%c0_132, %c0_133], %180 {strides = array<i32>} : memref<2x128xf32, #tpu.memory_space<vmem>>, vector<2x128xf32>,
    return
  }
}

</mosaic_0001>

<bundles_post_ra>
// kernel: top_down_baseline_forward.1
= control target key start
LH: loop header
LB: loop body
LE: loop exit
PB: predicated region body
PF: predicated region fallthrough
CT: control target
= control target key end

     0   :  { %s4736_s0 = inlined_call_operand.vmem [shape: f32[32,32], index: 0, kind: input, shape index: {}]   ;;  %s4737_s1 = inlined_call_operand.vmem [shape: f32[2,64], index: 1, kind: input, shape index: {}]   ;;  %s4738_s2 = inlined_call_operand.vmem [shape: bf16[32,128], index: 2, kind: input, shape index: {}]   ;;  %s4739_s3 = inlined_call_operand.vmem [shape: f32[1,128], index: 3, kind: input, shape index: {}]   ;;  %s4740_s4 = inlined_call_operand.vmem [shape: bf16[2048,128], index: 4, kind: input, shape index: {}]   ;;  %s4741_s5 = inlined_call_operand.vmem [shape: f32[1,128], index: 5, kind: input, shape index: {}]   ;;  %s4742_s6 = inlined_call_operand.vmem [shape: bf16[128,64], index: 6, kind: input, shape index: {}]   ;;  %s4743_s7 = inlined_call_operand.vmem [shape: f32[1,64], index: 7, kind: input, shape index: {}]   ;;  %s4744_s8 = inlined_call_operand.vmem [shape: f32[6,64], index: 8, kind: input, shape index: {}]   ;;  %s4745_s9 = inlined_call_operand.vmem [shape: bf16[64,128], index: 9, kind: input, shape index: {}]   ;;  %s4746_s10 = inlined_call_operand.vmem [shape: f32[1,128], index: 10, kind: input, shape index: {}]   ;;  %s4747_s11 = inlined_call_operand.vmem [shape: bf16[768,128], index: 11, kind: input, shape index: {}]   ;;  %s4748_s12 = inlined_call_operand.vmem [shape: f32[1,128], index: 12, kind: input, shape index: {}]   ;;  %s4749_s13 = inlined_call_operand.vmem [shape: bf16[128,128], index: 13, kind: input, shape index: {}]   ;;  %s4750_s14 = inlined_call_operand.vmem [shape: f32[1,128], index: 14, kind: input, shape index: {}]   ;;  %s4751_s15 = inlined_call_operand.vmem [shape: f32[12,128], index: 15, kind: output, shape index: {0}]   ;;  %s4752_s16 = inlined_call_operand.hbm [shape: f32[2,128], index: 16, kind: output, shape index: {1}]   ;;  %s4753_s17 = inlined_call_operand.hbm [shape: f32[2,128], index: 17, kind: output, shape index: {2}]  }
   0x1   :  { %4756 = sst [smem:[#allocation11_spill]] %s4736_s0 }
   0x2   :  { %4757 = sst [smem:[#allocation12_spill]] %s4737_s1 }
   0x3   :  { %23 = vsyncpa [#allocation6], 0  ;;  %v3579_v0 = vld [vmem:[%s4738_s2] sm:$0xff]   ;;  %v3580_v1 = vld [vmem:[%s4738_s2 + $0x8] sm:$0xff]   ;;  %s4758_s0 = sld [smem:[#allocation11_spill]]  ;;  %vm85_vm0 = vcmask 261120  }
   0x4   :  { %3490 = vmatprep.subr.bf16.mxu0 %v3579_v0  ;;  %v3581_v7 = vld [vmem:[%s4742_s6] sm:$0xff]   ;;  %v3582_v8 = vld [vmem:[%s4742_s6 + $0x8] sm:$0xff]   ;;  %v3583_v10 = vld [vmem:[%s4742_s6 + $0x10] sm:$0xff]  }
   0x5   :  { %3491 = vmatpush3.bf16.msra.mxu0 %v3579_v0  ;;  %3498 = vmatprep.subr.bf16.mxu1 %v3581_v7  ;;  %v3586_v11 = vld [vmem:[%s4740_s4 + $0x40] sm:$0xff]   ;;  %v3584_v13 = vld [vmem:[%s4742_s6 + $0x18] sm:$0xff]   ;;  %v3589_v14 = vld [vmem:[%s4740_s4 + $0x48] sm:$0xff]  }
   0x6   :  { %3492 = vmatprep.subr.bf16.mxu0 %v3580_v1  ;;  %3499 = vmatpush3.bf16.msra.mxu1 %v3581_v7  ;;  %v3587_v12 = vld [vmem:[%s4740_s4] sm:$0xff]   ;;  %v3590_v15 = vld [vmem:[%s4740_s4 + $0x8] sm:$0xff]   ;;  %v3591_v18 = vld [vmem:[%s4742_s6 + $0x30] sm:$0xff]  }
   0x7   :  { %3500 = vmatprep.subr.bf16.mxu1 %v3582_v8  ;;  %v3585_v16 = vld [vmem:[%s4742_s6 + $0x20] sm:$0xff]   ;;  %v3588_v17 = vld [vmem:[%s4742_s6 + $0x28] sm:$0xff]   ;;  %v3592_v19 = vld [vmem:[%s4740_s4 + $0x50] sm:$0xff]  }
   0x8   :  { %v3593_v20 = vld [vmem:[%s4740_s4 + $0x10] sm:$0xff]   ;;  %v3594_v21 = vld [vmem:[%s4742_s6 + $0x38] sm:$0xff]   ;;  %v3597_v24 = vld [vmem:[%s4740_s4 + $0x60] sm:$0xff]  }
   0x9   :  { %v56_v2 = vld [vmem:[%s4758_s0] sm:$0xff]  ;;  %v57_v3 = vld [vmem:[%s4758_s0 + $0x8] sm:$0xff]  ;;  %v58_v4 = vld [vmem:[%s4758_s0 + $0x10] sm:$0xff]  ;;  %3493 = vmatpush3.bf16.msra.mxu0 %v3580_v1 }
   0xa   :  { %v60_v5 = vpack.c.bf16 %v57_v3, %v56_v2  ;;  %v59_v6 = vld [vmem:[%s4758_s0 + $0x18] sm:$0xff]  ;;  %3501 = vmatpush3.bf16.msra.mxu1 %v3582_v8  ;;  %3226 = vmatprep.subr.bf16.mxu0 %v3586_v11  ;;  %v3598_v25 = vld [vmem:[%s4740_s4 + $0xc0] sm:$0xff]   ;;  %v3601_v27 = vld [vmem:[%s4740_s4 + $0x68] sm:$0xff]  }
   0xb   :  { %v61_v9 = vpack.c.bf16 %v59_v6, %v58_v4  ;;  %3502 = vmatprep.subr.bf16.mxu1 %v3583_v10  ;;  %v3595_v22 = vld [vmem:[%s4740_s4 + $0x58] sm:$0xff]   ;;  %v3599_v26 = vld [vmem:[%s4740_s4 + $0x20] sm:$0xff]   ;;  %v3603_v28 = vld [vmem:[%s4740_s4 + $0x28] sm:$0xff]  }
   0xc   :  { %3494 = vmatprep.mubr.msk.bf16.mxu0 %vm85_vm0, %v60_v5  ;;  %v3596_v23 = vld [vmem:[%s4740_s4 + $0x18] sm:$0xff]   ;;  %v3605_v29 = vld [vmem:[%s4740_s4 + $0x70] sm:$0xff]   ;;  %v3614_v33 = vld [vmem:[%s4740_s4 + $0x140] sm:$0xff]  }
   0xd   :  { %3495 = vmatmul.mubr.msk.bf16.vlgmr.msra.gmra.mrb[0].mxu0 %vm85_vm0, %v61_v9  ;;  %v3607_v30 = vld [vmem:[%s4740_s4 + $0x30] sm:$0xff]   ;;  %v3609_v31 = vld [vmem:[%s4740_s4 + $0x78] sm:$0xff]  }
   0xe   :  { %3227 = vmatpush3.bf16.msra.mxu0 %v3587_v12  ;;  %3503 = vmatpush3.bf16.msra.mxu1 %v3583_v10  ;;  %v3611_v32 = vld [vmem:[%s4740_s4 + $0x38] sm:$0xff]  }
   0xf   :  { %3228 = vmatprep.subr.bf16.mxu0 %v3589_v14  ;;  %3504 = vmatprep.subr.bf16.mxu1 %v3584_v13 }
  0x12   :  { %3229 = vmatpush3.bf16.msra.mxu0 %v3590_v15  ;;  %3505 = vmatpush3.bf16.msra.mxu1 %v3584_v13 }
  0x13   :  { %3506 = vmatprep.subr.bf16.mxu1 %v3585_v16  ;;  %3230 = vmatprep.subr.bf16.mxu0 %v3592_v19 }
  0x16   :  { %3507 = vmatpush3.bf16.msra.mxu1 %v3585_v16  ;;  %3231 = vmatpush3.bf16.msra.mxu0 %v3593_v20 }
  0x17   :  { %3508 = vmatprep.subr.bf16.mxu1 %v3588_v17  ;;  %3232 = vmatprep.subr.bf16.mxu0 %v3595_v22 }
  0x1a   :  { %3509 = vmatpush3.bf16.msra.mxu1 %v3588_v17  ;;  %3233 = vmatpush3.bf16.msra.mxu0 %v3596_v23 }
  0x1b   :  { %3510 = vmatprep.subr.bf16.mxu1 %v3591_v18  ;;  %3234 = vmatprep.subr.bf16.mxu0 %v3597_v24 }
  0x1e   :  { %3511 = vmatpush3.bf16.msra.mxu1 %v3591_v18  ;;  %3235 = vmatpush3.bf16.msra.mxu0 %v3599_v26 }
  0x1f   :  { %3512 = vmatprep.subr.bf16.mxu1 %v3594_v21  ;;  %3236 = vmatprep.subr.bf16.mxu0 %v3601_v27 }
  0x22   :  { %3513 = vmatpush3.bf16.msra.mxu1 %v3594_v21  ;;  %3237 = vmatpush3.bf16.msra.mxu0 %v3603_v28 }
  0x23   :  { %3248 = vmatprep.subr.bf16.mxu1 %v3598_v25  ;;  %3238 = vmatprep.subr.bf16.mxu0 %v3605_v29 }
  0x26   :  { %3239 = vmatpush3.bf16.msra.mxu0 %v3607_v30 }
  0x27   :  { %3240 = vmatprep.subr.bf16.mxu0 %v3609_v31 }
  0x2a   :  { %3241 = vmatpush3.bf16.msra.mxu0 %v3611_v32 }
  0x2b   :  { %3270 = vmatprep.subr.bf16.mxu0 %v3614_v33 }
  0x2c   :  { %24 = vsyncpa [#allocation8], 0  ;;  %v3838_v34 = vmov 1983009808   ;;  %v276_v36 = vlaneseq  ;;  %v2971_v39 = vld [vmem:[%s4739_s3] ss:$0 sm:$0xff] }
  0x2d   :  { %v274_v35 = vunpack.c.l.s4 %v3838_v34  ;;  %v3600_v17 = vld [vmem:[%s4740_s4 + $0x80] sm:$0xff]   ;;  %v3602_v22 = vld [vmem:[%s4740_s4 + $0xc8] sm:$0xff]   ;;  %v3606_v29 = vld [vmem:[%s4740_s4 + $0xd0] sm:$0xff]   ;;  %vm3840_vm1 = vmmov 0   ;;  %vm1904_vm2 = vcmask 523264   ;;  %s4759_s18 = sld [smem:[#allocation12_spill]] }
  0x2e   :  { %v277_v38 = vshrl.u32 %v276_v36, 7  ;;  %v3604_v28 = vld [vmem:[%s4740_s4 + $0x88] sm:$0xff]   ;;  %v3608_v32 = vld [vmem:[%s4740_s4 + $0x90] sm:$0xff]   ;;  %vm1951_vm3 = vcmask 128000   ;;  %vm1964_vm4 = vcmask 130048   ;;  %vm2009_vm5 = vcmask 521216  }
  0x2f   :  { %v275_v37 = vunpack.c.0.s8 %v274_v35  ;;  %v3610_v35 = vld [vmem:[%s4740_s4 + $0xd8] sm:$0xff]   ;;  %s3841_s20 = smov [#allocation7]  }
  0x30   :  { %s2957_s21 = sshll.u32 %s3841_s20, 4  ;;  %s2958_s21 = int_to_ptr.vmem [resolvable:$true] %s2957_s21 }
  0x31   :  { %v4034_v42 = vsub.s32 %v275_v37, %v277_v38  ;;  %s3790_s2 = scalar_lea.vmem %s2958_s21, 32  ;;  %p3795_p1 = scmp.lt.s32.totalorder %s2958_s21, %s2958_s21 }
  0x32   :  { %p3791_p0 = scmp.ne.s32.totalorder %s2958_s21, %s3790_s2  ;;  %p3796_p2 = scmp.lt.s32.totalorder %s3790_s2, %s3790_s2 }
  0x34   :  { %p3797_p3 = por %p3796_p2, %p3795_p1 }
  0x36   :  { %p3798_p4 = pnand %p3797_p3, %p3791_p0 }
  0xe0   :  { %v3496_v40 = vpop.f32.mrb[0].mxu0 }
  0xe1   :  { %v135_v41 = vadd.f32 %v3496_v40, %v2971_v39  ;;  %v126_v43 = vpop.f32.mrb[1].mxu0  ;;  %v3612_v40 = vld [vmem:[%s4740_s4 + $0x98] sm:$0xff]  }
  0xe2   :  { %v127_v44 = vadd.f32 %v2971_v39, %v126_v43  ;;  %v3497_v45 = vpop.f32.mrb[2].mxu0  ;;  %v3616_v43 = vld [vmem:[%s4740_s4 + $0x100] sm:$0xff]  }
  0xe3   :  { %v4036_v46 = vmax.f32 %v135_v41, 0.0  ;;  %v138_v47 = vadd.f32 %v3497_v45, %v2971_v39  ;;  %v129_v48 = vpop.f32.mrb[3].mxu0 }
  0xe4   :  { %v141_v49 = vmax.f32 %v127_v44, 0.0  ;;  %v130_v50 = vadd.f32 %v2971_v39, %v129_v48 }
  0xe5   :  { %353 = vst [vmem:[#allocation2 + $0x1] sm:$0x1] %v4036_v46  ;;  %v361_v51 = vrot.slane %v4036_v46, %v4034_v42  ;;  %v373_v52 = vcombine.high %v4036_v46, %v4036_v46  ;;  %v4043_v53 = vmax.f32 %v138_v47, 0.0 }
  0xe6   :  { %271 = vst [vmem:[#allocation2] sm:$0x1] %v141_v49  ;;  %v279_v54 = vrot.slane %v141_v49, %v4034_v42  ;;  %v291_v55 = vcombine.high %v141_v49, %v141_v49  ;;  %v142_v56 = vmax.f32 %v130_v50, 0.0  ;;  %v3619_v50 = vld [vmem:[%s4740_s4 + $0x148] sm:$0xff]  }
  0xe7   :  { %v2995_v57 = vrot.slane %v361_v51, 9  ;;  %v366_v58 = vcombine.high %v361_v51, %v361_v51  ;;  %v380_v59 = vrot.slane %v373_v52, %v4034_v42  ;;  %2997 = vst.sshfl [vmem:[#allocation2 + $0x9] sm:$0x1 pattern:$0x76325410] %v373_v52  ;;  %v402_v60 = vrot.slane %v4043_v53, %v4034_v42  ;;  %v3615_v51 = vld [vmem:[%s4740_s4 + $0xa0] sm:$0xff]  }
  0xe8   :  { %394 = vst [vmem:[#allocation2 + $0x11] sm:$0x1] %v4043_v53  ;;  %v2985_v61 = vrot.slane %v279_v54, 9  ;;  %v284_v62 = vcombine.high %v279_v54, %v279_v54  ;;  %v298_v63 = vrot.slane %v291_v55, %v4034_v42  ;;  %v414_v0 = vcombine.high %v4043_v53, %v4043_v53  ;;  %312 = vst [vmem:[#allocation2 + $0x10] sm:$0x1] %v142_v56  ;;  %v3621_v52 = vld [vmem:[%s4740_s4 + $0x108] sm:$0xff]  }
  0xe9   :  { %2987 = vst.sshfl [vmem:[#allocation2 + $0x8] sm:$0x1 pattern:$0x76325410] %v291_v55  ;;  %365 = vst [vmem:[#allocation2 + $0x3] sm:$0x1] %v2995_v57  ;;  %v387_v3 = vcombine.high %v380_v59, %v380_v59  ;;  %v407_v8 = vcombine.high %v402_v60, %v402_v60  ;;  %v320_v11 = vrot.slane %v142_v56, %v4034_v42 }
  0xea   :  { %368 = vst [vmem:[#allocation2 + $0x5] sm:$0x1] %v366_v58  ;;  %v2996_v1 = vrot.slane %v366_v58, 9  ;;  %v2998_v2 = vrot.slane %v380_v59, 9  ;;  %v3000_v4 = vrot.slane %v402_v60, 9  ;;  %v2986_v5 = vrot.slane %v284_v62, 9 }
  0xeb   :  { %283 = vst [vmem:[#allocation2 + $0x2] sm:$0x1] %v2985_v61  ;;  %286 = vst [vmem:[#allocation2 + $0x4] sm:$0x1] %v284_v62  ;;  %v2988_v6 = vrot.slane %v298_v63, 9  ;;  %v305_v7 = vcombine.high %v298_v63, %v298_v63  ;;  %v2999_v9 = vrot.slane %v387_v3, 9  ;;  %v421_v10 = vrot.slane %v414_v0, %v4034_v42 }
  0xec   :  { %3002 = vst.sshfl [vmem:[#allocation2 + $0x19] sm:$0x1 pattern:$0x76325410] %v414_v0  ;;  %372 = vst [vmem:[#allocation2 + $0x7] sm:$0x1] %v2996_v1  ;;  %v332_v12 = vcombine.high %v142_v56, %v142_v56  ;;  %v145_v15 = vpack.c.bf16 %v142_v56, %v141_v49  ;;  %v146_v16 = vpack.c.bf16 %v4043_v53, %v4036_v46 }
  0xed   :  { %386 = vst [vmem:[#allocation2 + $0xb] sm:$0x1] %v2998_v2  ;;  %389 = vst [vmem:[#allocation2 + $0xd] sm:$0x1] %v387_v3  ;;  %v2989_v13 = vrot.slane %v305_v7, 9  ;;  %v3001_v14 = vrot.slane %v407_v8, 9  ;;  %v428_v19 = vcombine.high %v421_v10, %v421_v10  ;;  %v325_v21 = vcombine.high %v320_v11, %v320_v11 }
  0xee   :  { %406 = vst [vmem:[#allocation2 + $0x13] sm:$0x1] %v3000_v4  ;;  %290 = vst [vmem:[#allocation2 + $0x6] sm:$0x1] %v2986_v5  ;;  %v3003_v18 = vrot.slane %v421_v10, 9  ;;  %v2990_v20 = vrot.slane %v320_v11, 9  ;;  %v339_v23 = vrot.slane %v332_v12, %v4034_v42  ;;  %3514 = vmatprep.mubr.bf16.mxu1 %v145_v15 }
  0xef   :  { %304 = vst [vmem:[#allocation2 + $0xa] sm:$0x1] %v2988_v6  ;;  %307 = vst [vmem:[#allocation2 + $0xc] sm:$0x1] %v305_v7  ;;  %v3004_v24 = vrot.slane %v428_v19, 9  ;;  %v2991_v25 = vrot.slane %v325_v21, 9  ;;  %3515 = vmatmul.mubr.bf16.vlgmr.msra.gmra.mrb[0].mxu1 %v146_v16 }
  0xf0   :  { %409 = vst [vmem:[#allocation2 + $0x15] sm:$0x1] %v407_v8  ;;  %393 = vst [vmem:[#allocation2 + $0xf] sm:$0x1] %v2999_v9  ;;  %v2993_v26 = vrot.slane %v339_v23, 9  ;;  %v346_v27 = vcombine.high %v339_v23, %v339_v23  ;;  %3249 = vmatpush3.bf16.msra.mxu1 %v3600_v17  ;;  %v3613_v46 = vld [vmem:[%s4740_s4 + $0xe0] sm:$0xff]  }
  0xf1   :  { %2992 = vst.sshfl [vmem:[#allocation2 + $0x18] sm:$0x1 pattern:$0x76325410] %v332_v12  ;;  %311 = vst [vmem:[#allocation2 + $0xe] sm:$0x1] %v2989_v13  ;;  %3250 = vmatprep.subr.bf16.mxu1 %v3602_v22 }
  0xf2   :  { %413 = vst [vmem:[#allocation2 + $0x17] sm:$0x1] %v3001_v14  ;;  %427 = vst [vmem:[#allocation2 + $0x1b] sm:$0x1] %v3003_v18  ;;  %v2994_v30 = vrot.slane %v346_v27, 9  ;;  %v3618_v53 = vld [vmem:[%s4740_s4 + $0xe8] sm:$0xff]  }
  0xf3   :  { %430 = vst [vmem:[#allocation2 + $0x1d] sm:$0x1] %v428_v19  ;;  %324 = vst [vmem:[#allocation2 + $0x12] sm:$0x1] %v2990_v20  ;;  %v3623_v54 = vld [vmem:[%s4740_s4 + $0x150] sm:$0xff]   ;;  %v3620_v55 = vld [vmem:[%s4740_s4 + $0xa8] sm:$0xff]  }
  0xf4   :  { %327 = vst [vmem:[#allocation2 + $0x14] sm:$0x1] %v325_v21  ;;  %434 = vst [vmem:[#allocation2 + $0x1f] sm:$0x1] %v3004_v24  ;;  %3251 = vmatpush3.bf16.msra.mxu1 %v3604_v28  ;;  %v3625_v56 = vld [vmem:[%s4740_s4 + $0x110] sm:$0xff]   ;;  %v3627_v58 = vld [vmem:[%s4740_s4 + $0x158] sm:$0xff]  }
  0xf5   :  { %331 = vst [vmem:[#allocation2 + $0x16] sm:$0x1] %v2991_v25  ;;  %345 = vst [vmem:[#allocation2 + $0x1a] sm:$0x1] %v2993_v26  ;;  %v435_v31 = vld [vmem:[#allocation2] sm:$0xff]  ;;  %3252 = vmatprep.subr.bf16.mxu1 %v3606_v29  ;;  %v3622_v57 = vld [vmem:[%s4740_s4 + $0xf0] sm:$0xff]  }
  0xf6   :  { %348 = vst [vmem:[#allocation2 + $0x1c] sm:$0x1] %v346_v27  ;;  %352 = vst [vmem:[#allocation2 + $0x1e] sm:$0x1] %v2994_v30  ;;  %v450_v33 = vrot.slane %v435_v31, %v4034_v42  ;;  %v443_v34 = vcombine.high %v435_v31, %v435_v31  ;;  %v3624_v60 = vld [vmem:[%s4740_s4 + $0xb0] sm:$0xff]   ;;  %v3629_v61 = vld [vmem:[%s4740_s4 + $0x118] sm:$0xff]  }
  0xf7   :  { %v3626_v62 = vld [vmem:[%s4740_s4 + $0xf8] sm:$0xff]   ;;  %v3630_v63 = vld [vmem:[%s4740_s4 + $0x160] sm:$0xff]   ;;  %v3635_v4 = vld [vmem:[%s4740_s4 + $0x168] sm:$0xff]  }
  0xf8   :  { %v436_v36 = vld [vmem:[#allocation2 + $0x8] sm:$0xff]  ;;  %v458_v37 = vcombine.high %v450_v33, %v450_v33  ;;  %v4078_v38 = vrot.slane %v443_v34, %v4034_v42  ;;  %3253 = vmatpush3.bf16.msra.mxu1 %v3608_v32  ;;  %v527_v47 = vpack.c.bf16 %v450_v33, %v450_v33  ;;  %v3628_v1 = vld [vmem:[%s4740_s4 + $0xb8] sm:$0xff]   ;;  %v3632_v2 = vld [vmem:[%s4740_s4 + $0x120] sm:$0xff]  }
  0xf9   :  { %v4081_v39 = vrot.slane %v436_v36, %v4034_v42  ;;  %3254 = vmatprep.subr.bf16.mxu1 %v3610_v35  ;;  %v460_v59 = vcombine.high %v436_v36, %v436_v36  ;;  %v3631_v3 = vld [vmem:[%s4740_s4 + $0x1c0] sm:$0xff]   ;;  %v3636_v8 = vld [vmem:[%s4740_s4 + $0x1c8] sm:$0xff]   ;;  %v3639_v11 = vld [vmem:[%s4740_s4 + $0x170] sm:$0xff]  }
  0xfa   :  { %v528_v41 = vpack.c.bf16 %v458_v37, %v458_v37  ;;  %v459_v44 = vcombine.high %v4078_v38, %v4078_v38  ;;  %v3633_v6 = vld [vmem:[%s4740_s4 + $0x180] sm:$0xff]   ;;  %v529_v7 = vpack.c.bf16 %v4078_v38, %v4078_v38  ;;  %v3637_v9 = vld [vmem:[%s4740_s4 + $0x128] sm:$0xff]   ;;  %v3640_v13 = vld [vmem:[%s4740_s4 + $0x1d0] sm:$0xff]  }
  0xfb   :  { %v475_v45 = vcombine.high %v4081_v39, %v4081_v39  ;;  %v4136_v0 = vrot.slane %v460_v59, %v4034_v42  ;;  %v3638_v12 = vld [vmem:[%s4740_s4 + $0x188] sm:$0xff]   ;;  %v3641_v14 = vld [vmem:[%s4740_s4 + $0x130] sm:$0xff]   ;;  %v3643_v16 = vld [vmem:[%s4740_s4 + $0x178] sm:$0xff]   ;;  %v531_v26 = vpack.c.bf16 %v4081_v39, %v4081_v39 }
  0xfc   :  { %1606 = vmatprep.mubr.bf16.mxu0 %v528_v41  ;;  %v530_v48 = vpack.c.bf16 %v459_v44, %v459_v44  ;;  %3255 = vmatpush3.bf16.msra.mxu1 %v3612_v40  ;;  %v437_v15 = vld [vmem:[#allocation2 + $0x10] sm:$0xff]  ;;  %v3644_v19 = vld [vmem:[%s4740_s4 + $0x1d8] sm:$0xff]   ;;  %v3648_v21 = vld [vmem:[%s4740_s4 + $0x240] sm:$0xff]  }
  0xfd   :  { %v532_v49 = vpack.c.bf16 %v475_v45, %v475_v45  ;;  %1607 = vmatmul.mubr.bf16.vlgmr.msra.gmra.mrb[4].mxu0 %v527_v47  ;;  %3256 = vmatprep.subr.bf16.mxu1 %v3613_v46  ;;  %v476_v5 = vcombine.high %v4136_v0, %v4136_v0  ;;  %v3642_v17 = vld [vmem:[%s4740_s4 + $0x190] sm:$0xff]   ;;  %v4182_v18 = vrot.slane %v437_v15, %v4034_v42  ;;  %v3645_v20 = vld [vmem:[%s4740_s4 + $0x138] sm:$0xff]   ;;  %v3647_v24 = vld [vmem:[%s4740_s4 + $0x1e0] sm:$0xff]  }
  0xfe   :  { %3271 = vmatpush3.bf16.msra.mxu0 %v3616_v43  ;;  %1646 = vmatprep.mubr.bf16.mxu1 %v530_v48  ;;  %v3646_v22 = vld [vmem:[%s4740_s4 + $0x198] sm:$0xff]   ;;  %v3650_v25 = vld [vmem:[%s4740_s4 + $0x200] sm:$0xff]   ;;  %v3652_v27 = vld [vmem:[%s4740_s4 + $0x248] sm:$0xff]   ;;  %v477_v37 = vcombine.high %v437_v15, %v437_v15 }
  0xff   :  { %1686 = vmatprep.mubr.bf16.mxu0 %v532_v49  ;;  %3272 = vmatprep.subr.bf16.mxu0 %v3619_v50  ;;  %v534_v10 = vpack.c.bf16 %v476_v5, %v476_v5  ;;  %v492_v23 = vcombine.high %v4182_v18, %v4182_v18  ;;  %v3649_v28 = vld [vmem:[%s4740_s4 + $0x1a0] sm:$0xff]   ;;  %v3651_v30 = vld [vmem:[%s4740_s4 + $0x1e8] sm:$0xff]   ;;  %v3656_v32 = vld [vmem:[%s4740_s4 + $0x250] sm:$0xff]   ;;  %v533_v50 = vpack.c.bf16 %v4136_v0, %v4136_v0 }
 0x100   :  { %3257 = vmatpush3.bf16.msra.mxu1 %v3615_v51  ;;  %v3654_v31 = vld [vmem:[%s4740_s4 + $0x208] sm:$0xff]   ;;  %v3655_v34 = vld [vmem:[%s4740_s4 + $0x1f0] sm:$0xff]   ;;  %v3660_v36 = vld [vmem:[%s4740_s4 + $0x258] sm:$0xff]   ;;  %v4246_v43 = vrot.slane %v477_v37, %v4034_v42  ;;  %v535_v5 = vpack.c.bf16 %v4182_v18, %v4182_v18 }
 0x101   :  { %3258 = vmatprep.subr.bf16.mxu1 %v3618_v53  ;;  %v536_v29 = vpack.c.bf16 %v492_v23, %v492_v23  ;;  %v3653_v33 = vld [vmem:[%s4740_s4 + $0x1a8] sm:$0xff]   ;;  %v3658_v35 = vld [vmem:[%s4740_s4 + $0x210] sm:$0xff]   ;;  %v3659_v39 = vld [vmem:[%s4740_s4 + $0x1f8] sm:$0xff]  }
 0x102   :  { %3273 = vmatpush3.bf16.msra.mxu0 %v3621_v52  ;;  %v3657_v38 = vld [vmem:[%s4740_s4 + $0x1b0] sm:$0xff]   ;;  %v3662_v40 = vld [vmem:[%s4740_s4 + $0x218] sm:$0xff]   ;;  %v3663_v41 = vld [vmem:[%s4740_s4 + $0x260] sm:$0xff]   ;;  %v493_v47 = vcombine.high %v4246_v43, %v4246_v43 }
 0x103   :  { %3274 = vmatprep.subr.bf16.mxu0 %v3623_v54  ;;  %v3661_v44 = vld [vmem:[%s4740_s4 + $0x1b8] sm:$0xff]   ;;  %v3664_v45 = vld [vmem:[%s4740_s4 + $0x2c0] sm:$0xff]   ;;  %v3668_v48 = vld [vmem:[%s4740_s4 + $0x268] sm:$0xff]  }
 0x104   :  { %3259 = vmatpush3.bf16.msra.mxu1 %v3620_v55  ;;  %v3665_v46 = vld [vmem:[%s4740_s4 + $0x220] sm:$0xff]   ;;  %v3669_v51 = vld [vmem:[%s4740_s4 + $0x2c8] sm:$0xff]   ;;  %v538_v53 = vpack.c.bf16 %v493_v47, %v493_v47  ;;  %v3672_v54 = vld [vmem:[%s4740_s4 + $0x270] sm:$0xff]  }
 0x105   :  { %3260 = vmatprep.subr.bf16.mxu1 %v3622_v57  ;;  %v3666_v49 = vld [vmem:[%s4740_s4 + $0x280] sm:$0xff]   ;;  %v3670_v52 = vld [vmem:[%s4740_s4 + $0x228] sm:$0xff]   ;;  %v3674_v57 = vld [vmem:[%s4740_s4 + $0x230] sm:$0xff]  }
 0x106   :  { %3275 = vmatpush3.bf16.msra.mxu0 %v3625_v56  ;;  %v3671_v55 = vld [vmem:[%s4740_s4 + $0x288] sm:$0xff]   ;;  %v3673_v56 = vld [vmem:[%s4740_s4 + $0x2d0] sm:$0xff]   ;;  %v3676_v59 = vld [vmem:[%s4740_s4 + $0x278] sm:$0xff]  }
 0x107   :  { %3276 = vmatprep.subr.bf16.mxu0 %v3627_v58  ;;  %v438_v58 = vld [vmem:[#allocation2 + $0x18] sm:$0xff]  ;;  %v3681_v0 = vld [vmem:[%s4740_s4 + $0x340] sm:$0xff]   ;;  %v3708_v37 = vld [vmem:[%s4740_s4 + $0x390] sm:$0xff]  }
 0x108   :  { %3261 = vmatpush3.bf16.msra.mxu1 %v3624_v60  ;;  %v3675_v60 = vld [vmem:[%s4740_s4 + $0x290] sm:$0xff]   ;;  %v3693_v15 = vld [vmem:[%s4740_s4 + $0x358] sm:$0xff]   ;;  %v3697_v23 = vld [vmem:[%s4740_s4 + $0x3c0] sm:$0xff]  }
 0x109   :  { %3262 = vmatprep.subr.bf16.mxu1 %v3626_v62  ;;  %v3677_v62 = vld [vmem:[%s4740_s4 + $0x2d8] sm:$0xff]   ;;  %v3716_v47 = vld [vmem:[%s4740_s4 + $0x3a8] sm:$0xff]  }
 0x10a   :  { %3277 = vmatpush3.bf16.msra.mxu0 %v3629_v61  ;;  %v4292_v61 = vrot.slane %v438_v58, %v4034_v42  ;;  %v3692_v18 = vld [vmem:[%s4740_s4 + $0x2f8] sm:$0xff]  }
 0x10b   :  { %3278 = vmatprep.subr.bf16.mxu0 %v3630_v63  ;;  %v3678_v63 = vld [vmem:[%s4740_s4 + $0x238] sm:$0xff]  }
 0x10c   :  { %3263 = vmatpush3.bf16.msra.mxu1 %v3628_v1  ;;  %v3679_v1 = vld [vmem:[%s4740_s4 + $0x298] sm:$0xff]  }
 0x10d   :  { %3292 = vmatprep.subr.bf16.mxu1 %v3631_v3  ;;  %v3680_v3 = vld [vmem:[%s4740_s4 + $0x2e0] sm:$0xff]  }
 0x10e   :  { %3279 = vmatpush3.bf16.msra.mxu0 %v3632_v2  ;;  %v509_v2 = vcombine.high %v4292_v61, %v4292_v61 }
 0x10f   :  { %3280 = vmatprep.subr.bf16.mxu0 %v3635_v4  ;;  %1647 = vmatmul.mubr.bf16.vlgmr.msra.gmra.mrb[4].mxu1 %v529_v7  ;;  %v3683_v4 = vld [vmem:[%s4740_s4 + $0x300] sm:$0xff]  }
 0x110   :  { %3293 = vmatpush3.bf16.msra.mxu1 %v3633_v6  ;;  %1726 = vmatprep.mubr.bf16.mxu1 %v534_v10  ;;  %v3685_v6 = vld [vmem:[%s4740_s4 + $0x348] sm:$0xff]   ;;  %v3682_v7 = vld [vmem:[%s4740_s4 + $0x2a0] sm:$0xff]  }
 0x111   :  { %3294 = vmatprep.subr.bf16.mxu1 %v3636_v8  ;;  %v540_v8 = vpack.c.bf16 %v509_v2, %v509_v2  ;;  %v3687_v10 = vld [vmem:[%s4740_s4 + $0x308] sm:$0xff]  }
 0x112   :  { %3281 = vmatpush3.bf16.msra.mxu0 %v3637_v9  ;;  %v3684_v9 = vld [vmem:[%s4740_s4 + $0x2e8] sm:$0xff]  }
 0x113   :  { %3282 = vmatprep.subr.bf16.mxu0 %v3639_v11  ;;  %v3689_v11 = vld [vmem:[%s4740_s4 + $0x350] sm:$0xff]  }
 0x114   :  { %3295 = vmatpush3.bf16.msra.mxu1 %v3638_v12  ;;  %v3686_v12 = vld [vmem:[%s4740_s4 + $0x2a8] sm:$0xff]  }
 0x115   :  { %3296 = vmatprep.subr.bf16.mxu1 %v3640_v13  ;;  %v3688_v13 = vld [vmem:[%s4740_s4 + $0x2f0] sm:$0xff]  }
 0x116   :  { %3283 = vmatpush3.bf16.msra.mxu0 %v3641_v14  ;;  %v3691_v14 = vld [vmem:[%s4740_s4 + $0x310] sm:$0xff]  }
 0x117   :  { %3284 = vmatprep.subr.bf16.mxu0 %v3643_v16  ;;  %v494_v16 = vcombine.high %v438_v58, %v438_v58 }
 0x118   :  { %3297 = vmatpush3.bf16.msra.mxu1 %v3642_v17  ;;  %v3690_v17 = vld [vmem:[%s4740_s4 + $0x2b0] sm:$0xff]  }
 0x119   :  { %3298 = vmatprep.subr.bf16.mxu1 %v3644_v19  ;;  %v3695_v19 = vld [vmem:[%s4740_s4 + $0x318] sm:$0xff]  }
 0x11a   :  { %3285 = vmatpush3.bf16.msra.mxu0 %v3645_v20  ;;  %v3696_v20 = vld [vmem:[%s4740_s4 + $0x360] sm:$0xff]  }
 0x11b   :  { %3314 = vmatprep.subr.bf16.mxu0 %v3648_v21  ;;  %v4356_v21 = vrot.slane %v494_v16, %v4034_v42 }
 0x11c   :  { %3299 = vmatpush3.bf16.msra.mxu1 %v3646_v22  ;;  %v3694_v22 = vld [vmem:[%s4740_s4 + $0x2b8] sm:$0xff]  }
 0x11d   :  { %1687 = vmatmul.mubr.bf16.vlgmr.msra.gmra.mrb[8].mxu0 %v531_v26  ;;  %3300 = vmatprep.subr.bf16.mxu1 %v3647_v24  ;;  %v3698_v24 = vld [vmem:[%s4740_s4 + $0x320] sm:$0xff]   ;;  %v3701_v26 = vld [vmem:[%s4740_s4 + $0x368] sm:$0xff]  }
 0x11e   :  { %3315 = vmatpush3.bf16.msra.mxu0 %v3650_v25  ;;  %1766 = vmatprep.mubr.bf16.mxu0 %v536_v29  ;;  %v510_v25 = vcombine.high %v4356_v21, %v4356_v21  ;;  %v3702_v29 = vld [vmem:[%s4740_s4 + $0x3c8] sm:$0xff]  }
 0x11f   :  { %3316 = vmatprep.subr.bf16.mxu0 %v3652_v27  ;;  %v3699_v27 = vld [vmem:[%s4740_s4 + $0x380] sm:$0xff]  }
 0x120   :  { %3301 = vmatpush3.bf16.msra.mxu1 %v3649_v28  ;;  %v537_v28 = vpack.c.bf16 %v4246_v43, %v4246_v43  ;;  %v539_v43 = vpack.c.bf16 %v4292_v61, %v4292_v61 }
 0x121   :  { %3302 = vmatprep.subr.bf16.mxu1 %v3651_v30  ;;  %v3703_v30 = vld [vmem:[%s4740_s4 + $0x328] sm:$0xff]  }
 0x122   :  { %3317 = vmatpush3.bf16.msra.mxu0 %v3654_v31  ;;  %v542_v31 = vpack.c.bf16 %v510_v25, %v510_v25 }
 0x123   :  { %3318 = vmatprep.subr.bf16.mxu0 %v3656_v32  ;;  %v3705_v32 = vld [vmem:[%s4740_s4 + $0x370] sm:$0xff]  }
 0x124   :  { %3303 = vmatpush3.bf16.msra.mxu1 %v3653_v33  ;;  %v3704_v33 = vld [vmem:[%s4740_s4 + $0x388] sm:$0xff]  }
 0x125   :  { %3304 = vmatprep.subr.bf16.mxu1 %v3655_v34  ;;  %v3706_v34 = vld [vmem:[%s4740_s4 + $0x3d0] sm:$0xff]  }
 0x126   :  { %3319 = vmatpush3.bf16.msra.mxu0 %v3658_v35  ;;  %v3707_v35 = vld [vmem:[%s4740_s4 + $0x330] sm:$0xff]  }
 0x127   :  { %3320 = vmatprep.subr.bf16.mxu0 %v3660_v36  ;;  %v3709_v36 = vld [vmem:[%s4740_s4 + $0x378] sm:$0xff]  }
 0x128   :  { %3305 = vmatpush3.bf16.msra.mxu1 %v3657_v38  ;;  %v3710_v38 = vld [vmem:[%s4740_s4 + $0x3d8] sm:$0xff]  }
 0x129   :  { %3306 = vmatprep.subr.bf16.mxu1 %v3659_v39  ;;  %v3711_v39 = vld [vmem:[%s4740_s4 + $0x338] sm:$0xff]  }
 0x12a   :  { %3321 = vmatpush3.bf16.msra.mxu0 %v3662_v40  ;;  %v3712_v40 = vld [vmem:[%s4740_s4 + $0x398] sm:$0xff]  }
 0x12b   :  { %3322 = vmatprep.subr.bf16.mxu0 %v3663_v41  ;;  %v3713_v41 = vld [vmem:[%s4740_s4 + $0x3e0] sm:$0xff]  }
 0x12c   :  { %3307 = vmatpush3.bf16.msra.mxu1 %v3661_v44  ;;  %v3839_v44 = vmov 0.0  }
 0x12d   :  { %3336 = vmatprep.subr.bf16.mxu1 %v3664_v45  ;;  %v3714_v45 = vld [vmem:[%s4740_s4 + $0x3a0] sm:$0xff]  }
 0x12e   :  { %3323 = vmatpush3.bf16.msra.mxu0 %v3665_v46  ;;  %v3715_v46 = vld [vmem:[%s4740_s4 + $0x3e8] sm:$0xff]  }
 0x12f   :  { %3324 = vmatprep.subr.bf16.mxu0 %v3668_v48  ;;  %1727 = vmatmul.mubr.bf16.vlgmr.msra.gmra.mrb[8].mxu1 %v533_v50  ;;  %v3717_v48 = vld [vmem:[%s4740_s4 + $0x3f0] sm:$0xff]   ;;  %v3719_v50 = vld [vmem:[%s4740_s4 + $0x3f8] sm:$0xff]  }
 0x130   :  { %3337 = vmatpush3.bf16.msra.mxu1 %v3666_v49  ;;  %1806 = vmatprep.mubr.bf16.mxu1 %v538_v53  ;;  %v3718_v49 = vld [vmem:[%s4740_s4 + $0x3b0] sm:$0xff]   ;;  %v2976_v53 = vld [vmem:[%s4743_s7] ss:$0 sm:$0xff] }
 0x131   :  { %3338 = vmatprep.subr.bf16.mxu1 %v3669_v51  ;;  %v3720_v51 = vld [vmem:[%s4740_s4 + $0x3b8] sm:$0xff]  }
 0x132   :  { %3325 = vmatpush3.bf16.msra.mxu0 %v3670_v52  ;;  %v541_v52 = vpack.c.bf16 %v4356_v21, %v4356_v21 }
 0x133   :  { %3326 = vmatprep.subr.bf16.mxu0 %v3672_v54 }
 0x134   :  { %3339 = vmatpush3.bf16.msra.mxu1 %v3671_v55 }
 0x135   :  { %3340 = vmatprep.subr.bf16.mxu1 %v3673_v56 }
 0x136   :  { %3327 = vmatpush3.bf16.msra.mxu0 %v3674_v57 }
 0x137   :  { %3328 = vmatprep.subr.bf16.mxu0 %v3676_v59 }
 0x138   :  { %3341 = vmatpush3.bf16.msra.mxu1 %v3675_v60 }
 0x139   :  { %3342 = vmatprep.subr.bf16.mxu1 %v3677_v62 }
 0x13a   :  { %3329 = vmatpush3.bf16.msra.mxu0 %v3678_v63 }
 0x13b   :  { %3358 = vmatprep.subr.bf16.mxu0 %v3681_v0 }
 0x13c   :  { %3343 = vmatpush3.bf16.msra.mxu1 %v3679_v1 }
 0x13d   :  { %1767 = vmatmul.mubr.bf16.vlgmr.msra.gmra.mrb[12].mxu0 %v535_v5  ;;  %3344 = vmatprep.subr.bf16.mxu1 %v3680_v3  ;;  %v4452_v3 = vld [vmem:[%s4744_s8] sm:$0x3f] }
 0x13e   :  { %3359 = vmatpush3.bf16.msra.mxu0 %v3683_v4  ;;  %1846 = vmatprep.mubr.bf16.mxu0 %v540_v8  ;;  %v3134_v4 = vld [vmem:[%s4759_s18] ss:$0 sm:$0xff] }
 0x13f   :  { %3360 = vmatprep.subr.bf16.mxu0 %v3685_v6 }
 0x140   :  { %3345 = vmatpush3.bf16.msra.mxu1 %v3682_v7  ;;  %v4459_v7 = vadd.f32 %v3134_v4, %v4452_v3 }
 0x141   :  { %3346 = vmatprep.subr.bf16.mxu1 %v3684_v9 }
 0x142   :  { %3361 = vmatpush3.bf16.msra.mxu0 %v3687_v10 }
 0x143   :  { %3362 = vmatprep.subr.bf16.mxu0 %v3689_v11 }
 0x144   :  { %3347 = vmatpush3.bf16.msra.mxu1 %v3686_v12  ;;  %v1902_v12 = vpack.c.bf16 %v4459_v7, %v4459_v7 }
 0x145   :  { %3348 = vmatprep.subr.bf16.mxu1 %v3688_v13 }
 0x146   :  { %3363 = vmatpush3.bf16.msra.mxu0 %v3691_v14  ;;  %v3005_v14 = vld [vmem:[%s4741_s5] ss:$0 sm:$0xff] }
 0x147   :  { %3364 = vmatprep.subr.bf16.mxu0 %v3693_v15 }
 0x148   :  { %3349 = vmatpush3.bf16.msra.mxu1 %v3690_v17 }
 0x149   :  { %3350 = vmatprep.subr.bf16.mxu1 %v3692_v18 }
 0x14a   :  { %3365 = vmatpush3.bf16.msra.mxu0 %v3695_v19 }
 0x14b   :  { %3366 = vmatprep.subr.bf16.mxu0 %v3696_v20 }
 0x14c   :  { %3351 = vmatpush3.bf16.msra.mxu1 %v3694_v22 }
 0x14d   :  { %3380 = vmatprep.subr.bf16.mxu1 %v3697_v23 }
 0x14e   :  { %3367 = vmatpush3.bf16.msra.mxu0 %v3698_v24 }
 0x14f   :  { %3368 = vmatprep.subr.bf16.mxu0 %v3701_v26  ;;  %1807 = vmatmul.mubr.bf16.vlgmr.msra.gmra.mrb[12].mxu1 %v537_v28 }
 0x150   :  { %3381 = vmatpush3.bf16.msra.mxu1 %v3699_v27  ;;  %1886 = vmatprep.mubr.bf16.mxu1 %v542_v31 }
 0x151   :  { %3382 = vmatprep.subr.bf16.mxu1 %v3702_v29 }
 0x152   :  { %3369 = vmatpush3.bf16.msra.mxu0 %v3703_v30 }
 0x153   :  { %3370 = vmatprep.subr.bf16.mxu0 %v3705_v32 }
 0x154   :  { %3383 = vmatpush3.bf16.msra.mxu1 %v3704_v33 }
 0x155   :  { %3384 = vmatprep.subr.bf16.mxu1 %v3706_v34 }
 0x156   :  { %3371 = vmatpush3.bf16.msra.mxu0 %v3707_v35 }
 0x157   :  { %3372 = vmatprep.subr.bf16.mxu0 %v3709_v36 }
 0x158   :  { %3385 = vmatpush3.bf16.msra.mxu1 %v3708_v37 }
 0x159   :  { %3386 = vmatprep.subr.bf16.mxu1 %v3710_v38 }
 0x15a   :  { %3373 = vmatpush3.bf16.msra.mxu0 %v3711_v39 }
 0x15b   :  { %3518 = vmatprep.subr.bf16.mxu0 %v3839_v44 }
 0x15c   :  { %3387 = vmatpush3.bf16.msra.mxu1 %v3712_v40 }
 0x15d   :  { %1847 = vmatmul.mubr.bf16.vlgmr.msra.gmra.mrb[16].mxu0 %v539_v43  ;;  %3388 = vmatprep.subr.bf16.mxu1 %v3713_v41 }
 0x15e   :  { %3520 = vmatprep.mubr.msk.bf16.mxu0 %vm3840_vm1, %v3839_v44 }
 0x160   :  { %3389 = vmatpush3.bf16.msra.mxu1 %v3714_v45 }
 0x161   :  { %3390 = vmatprep.subr.bf16.mxu1 %v3715_v46 }
 0x164   :  { %3391 = vmatpush3.bf16.msra.mxu1 %v3716_v47 }
 0x165   :  { %3392 = vmatprep.subr.bf16.mxu1 %v3717_v48 }
 0x168   :  { %3393 = vmatpush3.bf16.msra.mxu1 %v3718_v49 }
 0x169   :  { %3394 = vmatprep.subr.bf16.mxu1 %v3719_v50 }
 0x16c   :  { %3395 = vmatpush3.bf16.msra.mxu1 %v3720_v51 }
 0x16d   :  { %3542 = vmatprep.subr.bf16.mxu1 %v3839_v44 }
 0x16f   :  { %1887 = vmatmul.mubr.bf16.vlgmr.msra.gmra.mrb[16].mxu1 %v541_v52 }
 0x170   :  { %3550 = vmatprep.mubr.msk.bf16.mxu1 %vm3840_vm1, %v3839_v44 }
 0x1c2   :  { %v3516_v54 = vpop.f32.mrb[0].mxu1 }
 0x1c3   :  { %v261_v55 = vadd.f32 %v3516_v54, %v2976_v53  ;;  %v252_v56 = vpop.f32.mrb[1].mxu1 }
 0x1c4   :  { %v253_v57 = vadd.f32 %v2976_v53, %v252_v56  ;;  %v3517_v58 = vpop.f32.mrb[2].mxu1 }
 0x1c5   :  { %v264_v59 = vadd.f32 %v3517_v58, %v2976_v53  ;;  %v255_v60 = vpop.f32.mrb[3].mxu1  ;;  %v269_v62 = vmax.f32 %v261_v55, 0.0 }
 0x1c6   :  { %v256_v61 = vadd.f32 %v2976_v53, %v255_v60  ;;  %v267_v0 = vmax.f32 %v253_v57, 0.0 }
 0x1c7   :  { %v270_v63 = vmax.f32 %v264_v59, 0.0 }
 0x1c8   :  { %v268_v1 = vmax.f32 %v256_v61, 0.0 }
 0x1c9   :  { %v4447_v2 = vpack.c.bf16 %v270_v63, %v269_v62 }
 0x1ca   :  { %v1903_v5 = vpack.c.bf16 %v268_v1, %v267_v0 }
 0x1cc   :  { %v1909_v6 = vsel %vm1904_vm2, %v1903_v5, 0 }
 0x1cd   :  { %3519 = vmatpush3.bf16.xpose.msra.mxu0 %v1909_v6 }
 0x1ce   :  { %3524 = vmatprep.subr.bf16.mxu0 %v3839_v44 }
 0x1d0   :  { %v3242_v8 = vpop.f32.mrb[4].mxu0 }
 0x1d1   :  { %v3243_v9 = vpop.f32.mrb[5].mxu0 }
 0x1d2   :  { %v3244_v10 = vadd.f32 %v3243_v9, %v3242_v8  ;;  %v3245_v11 = vpop.f32.mrb[6].mxu0 }
 0x1d3   :  { %v3246_v13 = vpop.f32.mrb[7].mxu0 }
 0x1d4   :  { %3521 = vmatmul.mubr.msk.bf16.vlgmr.msra.gmra.mrb[20].mxu0 %vm1904_vm2, %v1902_v12  ;;  %v1609_v17 = vadd.f32 %v3244_v10, %v3005_v14  ;;  %v3137_v12 = vld [vmem:[%s4759_s18 + $0x1] ss:$0 sm:$0xff]  ;;  %v2023_v14 = vsel %vm1904_vm2, %v4447_v2, 0 }
 0x1d5   :  { %3525 = vmatpush3.bf16.msra.mxu0 %v1903_v5  ;;  %3526 = vmatprep.mubr.msk.bf16.mxu0 %vm3840_vm1, %v3839_v44 }
 0x1d6   :  { %3530 = vmatprep.subr.bf16.mxu0 %v3839_v44 }
 0x1e2   :  { %v3264_v15 = vpop.f32.mrb[4].mxu1 }
 0x1e3   :  { %v3265_v16 = vpop.f32.mrb[5].mxu1 }
 0x1e4   :  { %v3266_v18 = vadd.f32 %v3265_v16, %v3264_v15  ;;  %v3267_v19 = vpop.f32.mrb[6].mxu1  ;;  %v4480_v15 = vadd.f32 %v3137_v12, %v4452_v3 }
 0x1e5   :  { %v3268_v20 = vpop.f32.mrb[7].mxu1 }
 0x1e6   :  { %v1649_v21 = vadd.f32 %v3266_v18, %v1609_v17  ;;  %v2017_v16 = vpack.c.bf16 %v4480_v15, %v4480_v15 }
 0x1f0   :  { %v3286_v22 = vpop.f32.mrb[8].mxu0 }
 0x1f1   :  { %v3287_v23 = vpop.f32.mrb[9].mxu0 }
 0x1f2   :  { %v3288_v24 = vadd.f32 %v3287_v23, %v3286_v22  ;;  %v3289_v25 = vpop.f32.mrb[10].mxu0 }
 0x1f3   :  { %v3290_v26 = vpop.f32.mrb[11].mxu0 }
 0x1f4   :  { %v1689_v27 = vadd.f32 %v3288_v24, %v1649_v21 }
 0x202   :  { %v3308_v28 = vpop.f32.mrb[8].mxu1 }
 0x203   :  { %v3309_v29 = vpop.f32.mrb[9].mxu1 }
 0x204   :  { %v3310_v30 = vadd.f32 %v3309_v29, %v3308_v28  ;;  %v3311_v31 = vpop.f32.mrb[10].mxu1 }
 0x205   :  { %v3312_v32 = vpop.f32.mrb[11].mxu1 }
 0x206   :  { %v1729_v33 = vadd.f32 %v3310_v30, %v1689_v27 }
 0x210   :  { %v3330_v34 = vpop.f32.mrb[12].mxu0 }
 0x211   :  { %v3331_v35 = vpop.f32.mrb[13].mxu0 }
 0x212   :  { %v3332_v36 = vadd.f32 %v3331_v35, %v3330_v34  ;;  %v3333_v37 = vpop.f32.mrb[14].mxu0  ;;  %v3722_v34 = vld [vmem:[%s4745_s9 + $0x8] sm:$0xff]   ;;  %v3723_v35 = vld [vmem:[%s4745_s9 + $0x10] sm:$0xff]  }
 0x213   :  { %v3334_v38 = vpop.f32.mrb[15].mxu0  ;;  %v3725_v37 = vld [vmem:[%s4749_s13] sm:$0xff]  }
 0x214   :  { %v1769_v39 = vadd.f32 %v3332_v36, %v1729_v33  ;;  %v3724_v36 = vld [vmem:[%s4745_s9 + $0x18] sm:$0xff]   ;;  %v3730_v38 = vld [vmem:[%s4747_s11 + $0x40] sm:$0xff]  }
 0x222   :  { %v3352_v40 = vpop.f32.mrb[12].mxu1 }
 0x223   :  { %v3353_v41 = vpop.f32.mrb[13].mxu1 }
 0x224   :  { %v3354_v43 = vadd.f32 %v3353_v41, %v3352_v40  ;;  %v3355_v45 = vpop.f32.mrb[14].mxu1  ;;  %v3727_v40 = vld [vmem:[%s4749_s13 + $0x10] sm:$0xff]   ;;  %v3728_v41 = vld [vmem:[%s4749_s13 + $0x18] sm:$0xff]  }
 0x225   :  { %v3356_v46 = vpop.f32.mrb[15].mxu1  ;;  %v3732_v45 = vld [vmem:[%s4749_s13 + $0x28] sm:$0xff]  }
 0x226   :  { %v1809_v47 = vadd.f32 %v3354_v43, %v1769_v39  ;;  %v3726_v39 = vld [vmem:[%s4749_s13 + $0x8] sm:$0xff]   ;;  %v3729_v43 = vld [vmem:[%s4749_s13 + $0x20] sm:$0xff]  }
 0x230   :  { %v3374_v48 = vpop.f32.mrb[16].mxu0 }
 0x231   :  { %v3375_v49 = vpop.f32.mrb[17].mxu0 }
 0x232   :  { %v3376_v50 = vadd.f32 %v3375_v49, %v3374_v48  ;;  %v3377_v51 = vpop.f32.mrb[18].mxu0 }
 0x233   :  { %v3378_v52 = vpop.f32.mrb[19].mxu0 }
 0x234   :  { %v1849_v53 = vadd.f32 %v3376_v50, %v1809_v47 }
 0x242   :  { %v3396_v54 = vpop.f32.mrb[16].mxu1 }
 0x243   :  { %v3397_v55 = vpop.f32.mrb[17].mxu1 }
 0x244   :  { %v3398_v56 = vadd.f32 %v3397_v55, %v3396_v54  ;;  %v3399_v57 = vpop.f32.mrb[18].mxu1  ;;  %v3733_v55 = vld [vmem:[%s4747_s11 + $0x48] sm:$0xff]  }
 0x245   :  { %v3400_v58 = vpop.f32.mrb[19].mxu1  ;;  %v3735_v57 = vld [vmem:[%s4749_s13 + $0x30] sm:$0xff]  }
 0x246   :  { %v1889_v59 = vadd.f32 %v3398_v56, %v1849_v53  ;;  %v3731_v53 = vld [vmem:[%s4747_s11] sm:$0xff]   ;;  %v3734_v56 = vld [vmem:[%s4747_s11 + $0x8] sm:$0xff]   ;;  %v3736_v58 = vld [vmem:[%s4747_s11 + $0x50] sm:$0xff]  }
 0x248   :  { %1894 = vst [vmem:[#allocation7] sm:$0x3] %v1889_v59  ;;  %v3737_v59 = vld [vmem:[%s4747_s11 + $0x10] sm:$0xff]  }
 0x2a7   :  { %v1945_v60 = vpop.f32.mrb[20].mxu0 }
 0x2a8   :  { %v3522_v61 = vpop.f32.mrb[21].mxu0  ;;  %v1952_v62 = vsel %vm1951_vm3, %v1945_v60, -inf }
 0x2a9   :  { %1953 = vmax.xlane.f32.xlu0 %v1952_v62  ;;  %v1948_v63 = vpop.f32.mrb[22].mxu0  ;;  %v3739_v61 = vld [vmem:[%s4747_s11 + $0x58] sm:$0xff]  }
 0x2aa   :  { %v3523_v0 = vpop.f32.mrb[23].mxu0  ;;  %v3740_v62 = vld [vmem:[%s4747_s11 + $0x18] sm:$0xff]   ;;  %v3743_v63 = vld [vmem:[%s4747_s11 + $0x60] sm:$0xff]  }
 0x2ab   :  { %v3744_v0 = vld [vmem:[%s4747_s11 + $0x20] sm:$0xff]  }
 0x336   :  { %v1954_v1 = vpop.xlane.xlu0 %1953 }
 0x337   :  { %v1955_v4 = vsub.f32 %v1945_v60, %v1954_v1  ;;  %v3738_v60 = vld [vmem:[%s4749_s13 + $0x38] sm:$0xff]   ;;  %v3747_v1 = vld [vmem:[%s4747_s11 + $0x68] sm:$0xff]  }
 0x339   :  { %v1956_v5 = vmul.f32 1.442695, %v1955_v4  ;;  %v3748_v4 = vld [vmem:[%s4747_s11 + $0x28] sm:$0xff]  }
 0x33b   :  { %3782 = vpow2.f32 %v1956_v5  ;;  %v3751_v5 = vld [vmem:[%s4747_s11 + $0x70] sm:$0xff]  }
 0x345   :  { %v3783_v6 = vpop.eup %3782 }
 0x346   :  { %v1958_v8 = vsel %vm1951_vm3, %v3783_v6, 0.0 }
 0x347   :  { %1959 = vadd.xlane.f32.xlu0 %v1958_v8  ;;  %v3755_v8 = vld [vmem:[%s4747_s11 + $0x78] sm:$0xff]  }
 0x3d4   :  { %v1960_v9 = vpop.xlane.xlu0 %1959 }
 0x3d5   :  { %3784 = vrcp.f32 %v1960_v9  ;;  %v3756_v9 = vld [vmem:[%s4747_s11 + $0x38] sm:$0xff]  }
 0x3df   :  { %v3785_v10 = vpop.eup %3784 }
 0x3e0   :  { %v1962_v11 = vmul.f32 %v3785_v10, %v3783_v6  ;;  %v3752_v6 = vld [vmem:[%s4747_s11 + $0x30] sm:$0xff]   ;;  %v3759_v10 = vld [vmem:[%s4747_s11 + $0x140] sm:$0xff]  }
 0x3e2   :  { %v1963_v13 = vpack.c.bf16 %v1962_v11, %v1962_v11  ;;  %v3140_v11 = vld [vmem:[%s4746_s10] ss:$0 sm:$0xff] }
 0x3e4   :  { %3527 = vmatmul.mubr.msk.bf16.vlgmr.msra.gmra.mrb[24].mxu0 %vm1964_vm4, %v1963_v13 }
 0x3e5   :  { %3531 = vmatpush3.bf16.xpose.msra.mxu0 %v2023_v14  ;;  %3532 = vmatprep.mubr.msk.bf16.mxu0 %vm3840_vm1, %v3839_v44 }
 0x3e6   :  { %3536 = vmatprep.subr.bf16.mxu0 %v3839_v44 }
 0x3ec   :  { %3533 = vmatmul.mubr.msk.bf16.vlgmr.msra.gmra.mrb[28].mxu0 %vm1904_vm2, %v2017_v16 }
 0x3ed   :  { %3537 = vmatpush3.bf16.msra.mxu0 %v4447_v2  ;;  %3538 = vmatprep.mubr.msk.bf16.mxu0 %vm3840_vm1, %v3839_v44 }
 0x3ee   :  { %3554 = vmatprep.subr.bf16.mxu0 %v3839_v44 }
 0x4b7   :  { %v2002_v3 = vpop.f32.mrb[24].mxu0 }
 0x4b8   :  { %v2008_v17 = vmul.f32 %v2002_v3, %v4459_v7  ;;  %v3528_v18 = vpop.f32.mrb[25].mxu0  ;;  %v3721_v7 = vld [vmem:[%s4745_s9] sm:$0xff]  }
 0x4b9   :  { %v2005_v19 = vpop.f32.mrb[26].mxu0  ;;  %3543 = vmatpush3.bf16.msra.mxu1 %v3721_v7 }
 0x4ba   :  { %2010 = vst.msk [vmem:[#allocation3] sm:$0x3f] %vm2009_vm5, %v2008_v17  ;;  %v3529_v20 = vpop.f32.mrb[27].mxu0  ;;  %3544 = vmatprep.subr.bf16.mxu1 %v3839_v44 }
 0x4bd   :  { %3545 = vmatpush3.bf16.msra.mxu1 %v3722_v34 }
 0x4be   :  { %3546 = vmatprep.subr.bf16.mxu1 %v3839_v44 }
 0x4bf   :  { %v2059_v21 = vpop.f32.mrb[28].mxu0 }
 0x4c0   :  { %v3534_v22 = vpop.f32.mrb[29].mxu0  ;;  %v2065_v23 = vsel %vm1951_vm3, %v2059_v21, -inf }
 0x4c1   :  { %2066 = vmax.xlane.f32.xlu1 %v2065_v23  ;;  %v2062_v2 = vpop.f32.mrb[30].mxu0  ;;  %3547 = vmatpush3.bf16.msra.mxu1 %v3723_v35  ;;  %v3750_v35 = vld [vmem:[%s4747_s11 + $0x90] sm:$0xff]  }
 0x4c2   :  { %v3535_v24 = vpop.f32.mrb[31].mxu0  ;;  %3548 = vmatprep.subr.bf16.mxu1 %v3839_v44 }
 0x4c5   :  { %3549 = vmatpush3.bf16.msra.mxu1 %v3724_v36  ;;  %v3753_v36 = vld [vmem:[%s4747_s11 + $0xd8] sm:$0xff]  }
 0x4c6   :  { %3424 = vmatprep.subr.bf16.mxu1 %v3730_v38  ;;  %v3757_v38 = vld [vmem:[%s4747_s11 + $0xe0] sm:$0xff]  }
 0x54e   :  { %v2067_v25 = vpop.xlane.xlu1 %2066 }
 0x54f   :  { %v2068_v26 = vsub.f32 %v2059_v21, %v2067_v25  ;;  %v3742_v21 = vld [vmem:[%s4747_s11 + $0x80] sm:$0xff]   ;;  %v3745_v25 = vld [vmem:[%s4747_s11 + $0xc8] sm:$0xff]  }
 0x551   :  { %v2069_v27 = vmul.f32 1.442695, %v2068_v26 }
 0x553   :  { %3786 = vpow2.f32 %v2069_v27 }
 0x55d   :  { %v3787_v28 = vpop.eup %3786 }
 0x55e   :  { %v2071_v29 = vsel %vm1951_vm3, %v3787_v28, 0.0 }
 0x55f   :  { %2072 = vadd.xlane.f32.xlu1 %v2071_v29 }
 0x5ec   :  { %v2073_v30 = vpop.xlane.xlu1 %2072 }
 0x5ed   :  { %3788 = vrcp.f32 %v2073_v30 }
 0x5f7   :  { %v3789_v31 = vpop.eup %3788 }
 0x5f8   :  { %v2075_v32 = vmul.f32 %v3789_v31, %v3787_v28  ;;  %v3746_v31 = vld [vmem:[%s4747_s11 + $0x88] sm:$0xff]  }
 0x5fa   :  { %v2076_v33 = vpack.c.bf16 %v2075_v32, %v2075_v32 }
 0x5fc   :  { %3539 = vmatmul.mubr.msk.bf16.vlgmr.msra.gmra.mrb[32].mxu0 %vm1964_vm4, %v2076_v33  ;;  %v3749_v33 = vld [vmem:[%s4747_s11 + $0xd0] sm:$0xff]  }
 0x5fd   :  { %3570 = vmatprep.mubr.msk.bf16.mxu0 %vm3840_vm1, %v3839_v44  ;;  %3555 = vmatpush3.bf16.msra.mxu0 %v3725_v37  ;;  %v3754_v37 = vld [vmem:[%s4747_s11 + $0x98] sm:$0xff]  }
 0x5fe   :  { %3556 = vmatprep.subr.bf16.mxu0 %v3839_v44 }
 0x601   :  { %3557 = vmatpush3.bf16.msra.mxu0 %v3726_v39 }
 0x602   :  { %3558 = vmatprep.subr.bf16.mxu0 %v3839_v44 }
 0x605   :  { %3559 = vmatpush3.bf16.msra.mxu0 %v3727_v40 }
 0x606   :  { %3560 = vmatprep.subr.bf16.mxu0 %v3839_v44 }
 0x609   :  { %3561 = vmatpush3.bf16.msra.mxu0 %v3728_v41 }
 0x60a   :  { %3562 = vmatprep.subr.bf16.mxu0 %v3839_v44 }
 0x60d   :  { %3563 = vmatpush3.bf16.msra.mxu0 %v3729_v43 }
 0x60e   :  { %3564 = vmatprep.subr.bf16.mxu0 %v3839_v44 }
 0x611   :  { %3565 = vmatpush3.bf16.msra.mxu0 %v3732_v45  ;;  %v3758_v45 = vld [vmem:[%s4747_s11 + $0xa0] sm:$0xff]  }
 0x612   :  { %3566 = vmatprep.subr.bf16.mxu0 %v3839_v44 }
 0x615   :  { %3567 = vmatpush3.bf16.msra.mxu0 %v3735_v57 }
 0x616   :  { %3568 = vmatprep.subr.bf16.mxu0 %v3839_v44  ;;  %v3741_v44 = vld [vmem:[%s4747_s11 + $0xc0] sm:$0xff]  }
 0x619   :  { %3569 = vmatpush3.bf16.msra.mxu0 %v3738_v60  ;;  %v3768_v60 = vld [vmem:[%s4747_s11 + $0x150] sm:$0xff]  }
 0x61a   :  { %3446 = vmatprep.subr.bf16.mxu0 %v3741_v44  ;;  %v3771_v44 = vld [vmem:[%s4747_s11 + $0xb8] sm:$0xff]  }
 0x6cf   :  { %v2114_v46 = vpop.f32.mrb[32].mxu0 }
 0x6d0   :  { %v2120_v47 = vmul.f32 %v2114_v46, %v4480_v15  ;;  %v3540_v48 = vpop.f32.mrb[33].mxu0 }
 0x6d1   :  { %v2117_v49 = vpop.f32.mrb[34].mxu0 }
 0x6d2   :  { %2121 = vst.msk [vmem:[#allocation3 + $0x6] sm:$0x3f] %vm2009_vm5, %v2120_v47  ;;  %v3541_v50 = vpop.f32.mrb[35].mxu0  ;;  %v3760_v47 = vld [vmem:[%s4747_s11 + $0xe8] sm:$0xff]  }
 0x6d9   :  { %v2122_v51 = vld [vmem:[#allocation3] sm:$0xff]  ;;  %v2123_v52 = vld [vmem:[#allocation3 + $0x8] sm:$0xf] }
 0x6da   :  { %v2124_v54 = vpack.c.bf16 %v2123_v52, %v2122_v51  ;;  %v3761_v51 = vld [vmem:[%s4747_s11 + $0x100] sm:$0xff]  }
 0x6dc   :  { %3551 = vmatmul.mubr.msk.bf16.vlgmr.msra.gmra.mrb[20].mxu1 %vm1904_vm2, %v2124_v54  ;;  %v3762_v54 = vld [vmem:[%s4747_s11 + $0xa8] sm:$0xff]  }
 0x6dd   :  { %3425 = vmatpush3.bf16.msra.mxu1 %v3731_v53 }
 0x6de   :  { %3426 = vmatprep.subr.bf16.mxu1 %v3733_v55 }
 0x6e1   :  { %3427 = vmatpush3.bf16.msra.mxu1 %v3734_v56  ;;  %v3765_v56 = vld [vmem:[%s4747_s11 + $0xf0] sm:$0xff]  }
 0x6e2   :  { %3428 = vmatprep.subr.bf16.mxu1 %v3736_v58  ;;  %v3766_v58 = vld [vmem:[%s4747_s11 + $0x108] sm:$0xff]  }
 0x6e5   :  { %3429 = vmatpush3.bf16.msra.mxu1 %v3737_v59  ;;  %v3767_v59 = vld [vmem:[%s4747_s11 + $0xb0] sm:$0xff]  }
 0x6e6   :  { %3430 = vmatprep.subr.bf16.mxu1 %v3739_v61  ;;  %v3769_v61 = vld [vmem:[%s4747_s11 + $0xf8] sm:$0xff]  }
 0x6e9   :  { %3431 = vmatpush3.bf16.msra.mxu1 %v3740_v62  ;;  %v3770_v62 = vld [vmem:[%s4747_s11 + $0x110] sm:$0xff]  }
 0x6ea   :  { %3432 = vmatprep.subr.bf16.mxu1 %v3743_v63  ;;  %v3772_v63 = vld [vmem:[%s4747_s11 + $0x158] sm:$0xff]  }
 0x6ed   :  { %3433 = vmatpush3.bf16.msra.mxu1 %v3744_v0  ;;  %v3773_v0 = vld [vmem:[%s4747_s11 + $0x118] sm:$0xff]  }
 0x6ee   :  { %3434 = vmatprep.subr.bf16.mxu1 %v3747_v1  ;;  %v3774_v1 = vld [vmem:[%s4747_s11 + $0x160] sm:$0xff]  }
 0x6f1   :  { %3435 = vmatpush3.bf16.msra.mxu1 %v3748_v4 }
 0x6f2   :  { %3436 = vmatprep.subr.bf16.mxu1 %v3751_v5  ;;  %v3775_v5 = vld [vmem:[%s4747_s11 + $0x120] sm:$0xff]  }
 0x6f5   :  { %3437 = vmatpush3.bf16.msra.mxu1 %v3752_v6  ;;  %v3776_v6 = vld [vmem:[%s4747_s11 + $0x168] sm:$0xff]  }
 0x6f6   :  { %3438 = vmatprep.subr.bf16.mxu1 %v3755_v8  ;;  %v3777_v8 = vld [vmem:[%s4747_s11 + $0x128] sm:$0xff]  }
 0x6f9   :  { %3439 = vmatpush3.bf16.msra.mxu1 %v3756_v9  ;;  %v3778_v9 = vld [vmem:[%s4747_s11 + $0x170] sm:$0xff]  }
 0x6fa   :  { %3468 = vmatprep.subr.bf16.mxu1 %v3759_v10  ;;  %v3779_v10 = vld [vmem:[%s4747_s11 + $0x130] sm:$0xff]  }
 0x7af   :  { %v2201_v12 = vpop.f32.mrb[20].mxu1 }
 0x7b0   :  { %v2202_v13 = vadd.f32 %v3140_v11, %v2201_v12  ;;  %v3552_v14 = vpop.f32.mrb[21].mxu1  ;;  %v3781_v12 = vld [vmem:[%s4747_s11 + $0x138] sm:$0xff]  }
 0x7b1   :  { %v2204_v15 = vpop.f32.mrb[22].mxu1 }
 0x7b2   :  { %v2208_v16 = vmax.f32 %v2202_v13, 0.0  ;;  %v2205_v3 = vadd.f32 %v3140_v11, %v2204_v15  ;;  %v3553_v17 = vpop.f32.mrb[23].mxu1  ;;  %v3780_v11 = vld [vmem:[%s4747_s11 + $0x178] sm:$0xff]  }
 0x7b4   :  { %2325 = vst [vmem:[#allocation4] sm:$0x1] %v2208_v16  ;;  %v2333_v18 = vrot.slane %v2208_v16, %v4034_v42  ;;  %v2345_v19 = vcombine.high %v2208_v16, %v2208_v16  ;;  %v2209_v20 = vmax.f32 %v2205_v3, 0.0 }
 0x7b6   :  { %v3155_v22 = vrot.slane %v2333_v18, 9  ;;  %v2338_v23 = vcombine.high %v2333_v18, %v2333_v18  ;;  %v2352_v2 = vrot.slane %v2345_v19, %v4034_v42  ;;  %3157 = vst.sshfl [vmem:[#allocation4 + $0x8] sm:$0x1 pattern:$0x76325410] %v2345_v19  ;;  %v2210_v24 = vpack.c.bf16 %v2209_v20, %v2208_v16 }
 0x7b7   :  { %2366 = vst [vmem:[#allocation4 + $0x5] sm:$0x1] %v2209_v20  ;;  %v2374_v26 = vrot.slane %v2209_v20, %v4034_v42 }
 0x7b8   :  { %2337 = vst [vmem:[#allocation4 + $0x2] sm:$0x1] %v3155_v22  ;;  %2340 = vst [vmem:[#allocation4 + $0x4] sm:$0x1] %v2338_v23  ;;  %v3156_v27 = vrot.slane %v2338_v23, 9  ;;  %v3158_v28 = vrot.slane %v2352_v2, 9  ;;  %v2359_v29 = vcombine.high %v2352_v2, %v2352_v2  ;;  %3571 = vmatmul.mubr.bf16.vlgmr.msra.gmra.mrb[36].mxu0 %v2210_v24 }
 0x7b9   :  { %v3160_v7 = vrot.slane %v2374_v26, 9  ;;  %v2379_v30 = vcombine.high %v2374_v26, %v2374_v26  ;;  %3447 = vmatpush3.bf16.msra.mxu0 %v3742_v21 }
 0x7ba   :  { %2344 = vst [vmem:[#allocation4 + $0x6] sm:$0x1] %v3156_v27  ;;  %2358 = vst [vmem:[#allocation4 + $0xa] sm:$0x1] %v3158_v28  ;;  %v3159_v32 = vrot.slane %v2359_v29, 9  ;;  %3448 = vmatprep.subr.bf16.mxu0 %v3745_v25 }
 0x7bb   :  { %2361 = vst [vmem:[#allocation4 + $0x1] sm:$0x1] %v2359_v29  ;;  %2378 = vst [vmem:[#allocation4 + $0x7] sm:$0x1] %v3160_v7  ;;  %v3161_v34 = vrot.slane %v2379_v30, 9 }
 0x7bc   :  { %2381 = vst [vmem:[#allocation4 + $0x9] sm:$0x1] %v2379_v30  ;;  %2365 = vst [vmem:[#allocation4 + $0x3] sm:$0x1] %v3159_v32 }
 0x7bd   :  { %2385 = vst [vmem:[#allocation4 + $0xb] sm:$0x1] %v3161_v34  ;;  %3449 = vmatpush3.bf16.msra.mxu0 %v3746_v31 }
 0x7be   :  { %3450 = vmatprep.subr.bf16.mxu0 %v3749_v33 }
 0x7c1   :  { %3451 = vmatpush3.bf16.msra.mxu0 %v3750_v35 }
 0x7c2   :  { %3452 = vmatprep.subr.bf16.mxu0 %v3753_v36 }
 0x7c3   :  { %v2386_v39 = vld [vmem:[#allocation4] sm:$0xff] }
 0x7c4   :  { %v2397_v40 = vrot.slane %v2386_v39, %v4034_v42  ;;  %v2390_v41 = vcombine.high %v2386_v39, %v2386_v39  ;;  %v3162_v43 = vld.sshfl [vmem:[#allocation4 + $0x8] sm:$0x33 pattern:$0x76325410] }
 0x7c5   :  { %3453 = vmatpush3.bf16.msra.mxu0 %v3754_v37  ;;  %v2414_v49 = vcombine.high %v3162_v43, %v3162_v43  ;;  %v2425_v13 = vpack.c.bf16 %v3162_v43, %v3162_v43 }
 0x7c6   :  { %3454 = vmatprep.subr.bf16.mxu0 %v3757_v38  ;;  %v2405_v46 = vcombine.high %v2397_v40, %v2397_v40  ;;  %v2404_v48 = vrot.slane %v2390_v41, %v4034_v42  ;;  %v2421_v53 = vpack.c.bf16 %v2397_v40, %v2397_v40  ;;  %v3764_v42 = vld [vmem:[%s4747_s11 + $0x148] sm:$0xff]  }
 0x7c7   :  { %v2426_v57 = vpack.c.bf16 %v2414_v49, %v2414_v49 }
 0x7c8   :  { %v2422_v50 = vpack.c.bf16 %v2405_v46, %v2405_v46  ;;  %v2406_v52 = vcombine.high %v2404_v48, %v2404_v48  ;;  %v2423_v4 = vpack.c.bf16 %v2404_v48, %v2404_v48 }
 0x7c9   :  { %3455 = vmatpush3.bf16.msra.mxu0 %v3758_v45 }
 0x7ca   :  { %2850 = vmatprep.mubr.bf16.mxu1 %v2422_v50  ;;  %3456 = vmatprep.subr.bf16.mxu0 %v3760_v47  ;;  %v2424_v55 = vpack.c.bf16 %v2406_v52, %v2406_v52 }
 0x7cb   :  { %2851 = vmatmul.mubr.bf16.vlgmr.msra.gmra.mrb[24].mxu1 %v2421_v53 }
 0x7cc   :  { %3469 = vmatpush3.bf16.msra.mxu1 %v3761_v51  ;;  %2890 = vmatprep.mubr.bf16.mxu0 %v2424_v55 }
 0x7cd   :  { %3457 = vmatpush3.bf16.msra.mxu0 %v3762_v54  ;;  %2930 = vmatprep.mubr.bf16.mxu1 %v2426_v57 }
 0x7ce   :  { %3470 = vmatprep.subr.bf16.mxu1 %v3764_v42  ;;  %3458 = vmatprep.subr.bf16.mxu0 %v3765_v56 }
 0x7d0   :  { %3471 = vmatpush3.bf16.msra.mxu1 %v3766_v58 }
 0x7d1   :  { %3459 = vmatpush3.bf16.msra.mxu0 %v3767_v59  ;;  %3472 = vmatprep.subr.bf16.mxu1 %v3768_v60 }
 0x7d2   :  { %3460 = vmatprep.subr.bf16.mxu0 %v3769_v61 }
 0x7d4   :  { %3473 = vmatpush3.bf16.msra.mxu1 %v3770_v62 }
 0x7d5   :  { %3461 = vmatpush3.bf16.msra.mxu0 %v3771_v44  ;;  %3474 = vmatprep.subr.bf16.mxu1 %v3772_v63 }
 0x7d8   :  { %2891 = vmatmul.mubr.bf16.vlgmr.msra.gmra.mrb[40].mxu0 %v2423_v4  ;;  %3475 = vmatpush3.bf16.msra.mxu1 %v3773_v0 }
 0x7d9   :  { %3476 = vmatprep.subr.bf16.mxu1 %v3774_v1 }
 0x7dc   :  { %3477 = vmatpush3.bf16.msra.mxu1 %v3775_v5 }
 0x7dd   :  { %3478 = vmatprep.subr.bf16.mxu1 %v3776_v6 }
 0x7e0   :  { %3479 = vmatpush3.bf16.msra.mxu1 %v3777_v8 }
 0x7e1   :  { %3480 = vmatprep.subr.bf16.mxu1 %v3778_v9 }
 0x7e4   :  { %3481 = vmatpush3.bf16.msra.mxu1 %v3779_v10 }
 0x7e5   :  { %3482 = vmatprep.subr.bf16.mxu1 %v3780_v11 }
 0x7e8   :  { %3483 = vmatpush3.bf16.msra.mxu1 %v3781_v12 }
 0x7eb   :  { %2931 = vmatmul.mubr.bf16.vlgmr.msra.gmra.mrb[28].mxu1 %v2425_v13 }
 0x7ec   :  { %3801 = shalt.err (!%p3798_p4)
}
 0x7ed   :  { %s3802_s24 = scalar_lea.hbm %s4753_s17, 32 }
 0x7ee   :  { %p3803_p5 = scmp.ne.s32.totalorder %s4753_s17, %s3802_s24  ;;  %p3806_p6 = scmp.lt.u32.totalorder %s3802_s24, %s4753_s17 }
 0x7f0   :  { %p3808_p7 = pnand %p3806_p6, %p3803_p5 }
 0x7f2   :  { %3811 = shalt.err (!%p3808_p7)
}
 0x7f3   :  { %2960 = dma.vmem_to_hbm [thread:$0]  %s2958_s21, 32, %s4753_s17, [#allocation8]   ;;  %v3146_v14 = vld [vmem:[%s4750_s14] ss:$0 sm:$0xff] }
 0x7f4   :  { %v3163_v24 = vld [vmem:[%s4748_s12] ss:$0 sm:$0xff]  ;;  %s3842_s10 = smov [#allocation5]  }
 0x88b   :  { %v2316_v15 = vpop.f32.mrb[36].mxu0 }
 0x88c   :  { %v2317_v16 = vadd.f32 %v3146_v14, %v2316_v15  ;;  %v3572_v3 = vpop.f32.mrb[37].mxu0 }
 0x88d   :  { %v2319_v17 = vpop.f32.mrb[38].mxu0 }
 0x88e   :  { %2323 = vst [vmem:[%s4751_s15] sm:$0xff] %v2317_v16  ;;  %v2320_v18 = vadd.f32 %v3146_v14, %v2319_v17  ;;  %v3573_v19 = vpop.f32.mrb[39].mxu0 }
 0x890   :  { %2324 = vst [vmem:[%s4751_s15 + $0x8] sm:$0xf] %v2320_v18  ;;  %s2947_s15 = sshll.u32 %s3842_s10, 4  ;;  %s2948_s15 = int_to_ptr.vmem [resolvable:$true] %s2947_s15 }
 0x891   :  { %s3812_s30 = scalar_lea.vmem %s2948_s15, 32  ;;  %p3817_p9 = scmp.lt.s32.totalorder %s2948_s15, %s2948_s15 }
 0x892   :  { %p3813_p8 = scmp.ne.s32.totalorder %s2948_s15, %s3812_s30  ;;  %p3818_p10 = scmp.lt.s32.totalorder %s3812_s30, %s3812_s30 }
 0x894   :  { %p3819_p11 = por %p3818_p10, %p3817_p9 }
 0x896   :  { %p3820_p12 = pnand %p3819_p11, %p3813_p8 }
 0x89e   :  { %v3440_v20 = vpop.f32.mrb[24].mxu1 }
 0x89f   :  { %v3441_v21 = vpop.f32.mrb[25].mxu1 }
 0x8a0   :  { %v3442_v22 = vadd.f32 %v3441_v21, %v3440_v20  ;;  %v3443_v23 = vpop.f32.mrb[26].mxu1 }
 0x8a1   :  { %v3444_v2 = vpop.f32.mrb[27].mxu1 }
 0x8a2   :  { %v2853_v27 = vadd.f32 %v3442_v22, %v3163_v24 }
 0x8ab   :  { %v3462_v25 = vpop.f32.mrb[40].mxu0 }
 0x8ac   :  { %v3463_v26 = vpop.f32.mrb[41].mxu0 }
 0x8ad   :  { %v3464_v28 = vadd.f32 %v3463_v26, %v3462_v25  ;;  %v3465_v29 = vpop.f32.mrb[42].mxu0 }
 0x8ae   :  { %v3466_v7 = vpop.f32.mrb[43].mxu0 }
 0x8af   :  { %v2893_v30 = vadd.f32 %v3464_v28, %v2853_v27 }
 0x8be   :  { %v3484_v31 = vpop.f32.mrb[28].mxu1 }
 0x8bf   :  { %v3485_v32 = vpop.f32.mrb[29].mxu1 }
 0x8c0   :  { %v3486_v33 = vadd.f32 %v3485_v32, %v3484_v31  ;;  %v3487_v34 = vpop.f32.mrb[30].mxu1 }
 0x8c1   :  { %v3488_v35 = vpop.f32.mrb[31].mxu1 }
 0x8c2   :  { %v2933_v36 = vadd.f32 %v3486_v33, %v2893_v30 }
 0x8c4   :  { %2938 = vst [vmem:[#allocation5] sm:$0x3] %v2933_v36 }
 0x8c5   :  { %3823 = shalt.err (!%p3820_p12)
}
 0x8c6   :  { %s3824_s8 = scalar_lea.hbm %s4752_s16, 32 }
 0x8c7   :  { %p3825_p13 = scmp.ne.s32.totalorder %s4752_s16, %s3824_s8  ;;  %p3828_p0 = scmp.lt.u32.totalorder %s3824_s8, %s4752_s16 }
 0x8c9   :  { %p3830_p1 = pnand %p3828_p0, %p3825_p13 }
 0x8cb   :  { %3833 = shalt.err (!%p3830_p1)
}
 0x8cc   :  { %2950 = dma.vmem_to_hbm [thread:$0]  %s2948_s15, 32, %s4752_s16, [#allocation6]  }
 0x8cd   :  { %3834 = dma.done.wait [#allocation6], 32  }
 0x8ce   :  { %3835 = vsyncadd [#allocation6], 4294967264 }
 0x8cf   :  { %3836 = dma.done.wait [#allocation8], 32  }
 0x8d0   :  { %3837 = vsyncadd [#allocation8], 4294967264 }
 0x8d1   :  { %2969 = vsyncpa [#allocation6], 1 }
 0x8d2   :  { %2970 = vsyncpa [#allocation8], 1 }

</bundles_post_ra>
